<compile_context>
chip_gen: v5e
topology: v5e:2x2
jax: 0.10.0
libtpu: 0.0.40
codegen_flags: <defaults>
</compile_context>

<pallas_src>
import functools

import jax
import jax.numpy as jnp
from jax import lax
from jax.experimental import pallas as pl
from jax.experimental.pallas import tpu as pltpu

D = 400    # feature dim of the module (Linear(400, 400))
DP = 512   # lane-padded feature dim (multiple of 128)


def _round_up(x, m):
    return (x + m - 1) // m * m


def _feature_attention_kernel(x_ref, wqkv_ref, bqkv_ref, o_ref, *,
                              n_valid, n_pad, b_blk, approx_recip):
    # x_ref:    (b_blk, n_pad, 400)   f32   (row/batch zero-padded)
    # wqkv_ref: (400, 3*512)          f32 or bf16 (fused, pre-transposed,
    #                                  zero-padded output columns)
    # bqkv_ref: (1, 3*512)            f32
    # o_ref:    (b_blk, n_pad, 512)   f32   (lane-dense output)
    x = x_ref[...].reshape(b_blk * n_pad, D)          # fold batch into MXU M
    x = x.astype(wqkv_ref.dtype)

    # Fused q/k/v projection: one long MXU pass over the concatenated weight.
    qkv = jnp.dot(x, wqkv_ref[...], preferred_element_type=jnp.float32)
    qkv = qkv + bqkv_ref[...]
    qkv = qkv.reshape(b_blk, n_pad, 3 * DP)

    # Static, 512-aligned lane slices (no layout shuffles).
    q = qkv[:, :, 0 * DP:1 * DP]
    k = qkv[:, :, 1 * DP:2 * DP]
    v = qkv[:, :, 2 * DP:3 * DP]

    # scores = q @ k^T, contracting the feature dim of both operands
    # (no materialized XLU transpose of k).
    s = jnp.einsum('bnd,bmd->bnm', q, k, preferred_element_type=jnp.float32)

    if n_pad != n_valid:
        # Mask padded key columns out of the softmax (padded rows of x are
        # zero, but their keys are bias-only and must not receive weight).
        col = lax.broadcasted_iota(jnp.int32, s.shape, 2)
        s = jnp.where(col < n_valid, s, -1e30)

    # Numerically stable softmax.
    s = s - jnp.max(s, axis=-1, keepdims=True)
    p = jnp.exp(s)
    denom = jnp.sum(p, axis=-1, keepdims=True)
    if approx_recip:
        p = p * pl.reciprocal(denom, approx=True)   # EUP slot, ~1e-3 row-sum err
    else:
        p = p / denom                               # exact module semantics

    o = jnp.einsum('bnm,bmd->bnd', p, v, preferred_element_type=jnp.float32)
    o_ref[...] = o.astype(o_ref.dtype)


def prepare_params(wq, bq, wk, bk, wv, bv, *, weight_dtype=jnp.float32):
    """One-time packing of the three Linear(400,400) layers.

    Returns (wqkv, bqkv) with wqkv: (400, 1536) transposed + output-column
    zero-padded fused weight, bqkv: (1, 1536) fused bias.  Do this once at
    parameter-load time, NOT per forward call.
    """
    def pack_w(w):  # PyTorch (out, in) -> (in=400, out_pad=512) so kernel does x @ W
        return jnp.zeros((D, DP), jnp.float32).at[:, :D].set(w.T.astype(jnp.float32))

    def pack_b(bias):
        return jnp.zeros((1, DP), jnp.float32).at[0, :D].set(bias.astype(jnp.float32))

    wqkv = jnp.concatenate([pack_w(wq), pack_w(wk), pack_w(wv)],
                           axis=1).astype(weight_dtype)
    bqkv = jnp.concatenate([pack_b(bq), pack_b(bk), pack_b(bv)], axis=1)
    return wqkv, bqkv


def feature_attention_packed(x, wqkv, bqkv, *, approx_softmax_recip=False):
    """FeatureAttention forward with pre-packed parameters.

    x: (N, 400) or (B, N, 400) float32.
    """
    squeeze_batch = (x.ndim == 2)
    if squeeze_batch:
        x = x[None]
    b, n, d = x.shape
    assert d == D

    # Row padding: sublane-aligned for small N, lane-dense (128) once the
    # (n_pad, n_pad) score block is big enough to matter.
    if n >= 64:
        n_pad = _round_up(n, 128)
    else:
        n_pad = max(_round_up(n, 8), 8)

    # Fold batch instances so the fused projection sees M ~= 128-256 rows and
    # the per-step (~0.35 us) pipeline overhead amortizes.
    b_blk = max(1, min(b, 256 // n_pad))
    grid_b = pl.cdiv(b, b_blk)
    b_pad = grid_b * b_blk

    xp = x.astype(jnp.float32)
    if (b_pad, n_pad) != (b, n):
        xp = jnp.pad(xp, ((0, b_pad - b), (0, n_pad - n), (0, 0)))

    kernel = functools.partial(_feature_attention_kernel,
                               n_valid=n, n_pad=n_pad, b_blk=b_blk,
                               approx_recip=approx_softmax_recip)

    flops = b * (2 * n * d * (3 * d)     # fused qkv projection
                 + 2 * n * n * d         # q @ k^T
                 + 2 * n * n * d)        # p @ v
    bytes_accessed = (xp.size * xp.dtype.itemsize
                      + wqkv.size * wqkv.dtype.itemsize
                      + bqkv.size * bqkv.dtype.itemsize
                      + b_pad * n_pad * DP * 4)

    # VMEM budget from the actual footprint (weights double-buffered by the
    # default pipeline + per-step activations), clamped to a sane floor.
    w_bytes = wqkv.size * wqkv.dtype.itemsize + bqkv.size * bqkv.dtype.itemsize
    io_block_bytes = b_blk * n_pad * (DP + DP) * 4          # x (lane-padded) + out
    inter_bytes = b_blk * n_pad * (4 * DP + 2 * n_pad) * 4  # qkv + q/k/v views + scores
    vmem_limit = int(min(96 * 2**20,
                         max(8 * 2**20,
                             2 * w_bytes + 2 * io_block_bytes + inter_bytes)))

    out = pl.pallas_call(
        kernel,
        out_shape=jax.ShapeDtypeStruct((b_pad, n_pad, DP), jnp.float32),
        grid=(grid_b,),
        in_specs=[
            # b_blk folded instances per grid step.
            pl.BlockSpec((b_blk, n_pad, D), lambda i: (i, 0, 0)),
            # Fused weight / bias: same block for every step -> DMA'd once and
            # kept resident across the whole batch grid.
            pl.BlockSpec((D, 3 * DP), lambda i: (0, 0)),
            pl.BlockSpec((1, 3 * DP), lambda i: (0, 0)),
        ],
        out_specs=pl.BlockSpec((b_blk, n_pad, DP), lambda i: (i, 0, 0)),
        compiler_params=pltpu.CompilerParams(
            # Small grids: megacore sharding would duplicate the dominant
            # weight DMA across v7x's two TensorCores for no net win.
            dimension_semantics=("arbitrary",),
            vmem_limit_bytes=vmem_limit,
        ),
        cost_estimate=pl.CostEstimate(
            flops=flops,
            transcendentals=b * n * n,
            bytes_accessed=bytes_accessed,
        ),
    )(xp, wqkv, bqkv)

    # Padded rows / padded batch entries / lanes 400:512 are garbage by design.
    out = out[:b, :n, :D]
    if squeeze_batch:
        out = out[0]
    return out


def feature_attention(x, wq, bq, wk, bk, wv, bv, *,
                      weight_dtype=jnp.float32, approx_softmax_recip=False):
    """Convenience wrapper: packs parameters then runs the kernel.

    Prefer prepare_params() once + feature_attention_packed() per call.
    """
    wqkv, bqkv = prepare_params(wq, bq, wk, bk, wv, bv, weight_dtype=weight_dtype)
    return feature_attention_packed(x, wqkv, bqkv,
                                    approx_softmax_recip=approx_softmax_recip)


def _reference(x, wq, bq, wk, bk, wv, bv):
    q = x @ wq.T + bq
    k = x @ wk.T + bk
    v = x @ wv.T + bv
    s = jax.nn.softmax(q @ jnp.swapaxes(k, -1, -2), axis=-1)
    return s @ v


if __name__ == "__main__":
    key = jax.random.PRNGKey(0)
    kx, kxb, kwq, kbq, kwk, kbk, kwv, kbv = jax.random.split(key, 8)

    N = 8
    # Deterministic synthetic Linear(400, 400) x3 parameters (gentle scale so
    # the softmax is well conditioned for a tight numerical comparison).
    scale = 0.25 / jnp.sqrt(jnp.float32(D))
    x = jax.random.normal(kx, (N, D), dtype=jnp.float32)
    wq = jax.random.normal(kwq, (D, D), dtype=jnp.float32) * scale
    bq = jax.random.normal(kbq, (D,), dtype=jnp.float32) * 0.01
    wk = jax.random.normal(kwk, (D, D), dtype=jnp.float32) * scale
    bk = jax.random.normal(kbk, (D,), dtype=jnp.float32) * 0.01
    wv = jax.random.normal(kwv, (D, D), dtype=jnp.float32) * scale
    bv = jax.random.normal(kbv, (D,), dtype=jnp.float32) * 0.01

    ref = _reference(x, wq, bq, wk, bk, wv, bv)

    # One-time parameter packing (hoisted out of the per-call path).
    params_f32 = prepare_params(wq, bq, wk, bk, wv, bv, weight_dtype=jnp.float32)
    params_bf16 = prepare_params(wq, bq, wk, bk, wv, bv, weight_dtype=jnp.bfloat16)

    # 1) f32-weight, exact-softmax path: exact module semantics.
    out_f32 = feature_attention_packed(x, *params_f32)
    jax.block_until_ready(out_f32)
    assert out_f32.shape == (N, D)
    assert jnp.allclose(out_f32, ref, atol=2e-3, rtol=2e-3)

    # 2) bf16-weight + approx-reciprocal opt-in path (halves weight DMA bytes).
    out_bf16 = feature_attention_packed(x, *params_bf16,
                                        approx_softmax_recip=True)
    jax.block_until_ready(out_bf16)
    assert out_bf16.shape == (N, D)
    assert jnp.allclose(out_bf16, ref, atol=1e-2, rtol=1e-2)

    # 3) batched path: several instances folded into ONE grid step, with a
    #    node count that exercises the padded-row softmax mask.
    B, N2 = 3, 10
    xb = jax.random.normal(kxb, (B, N2, D), dtype=jnp.float32)
    out_b = feature_attention_packed(xb, *params_f32)
    jax.block_until_ready(out_b)
    ref_b = _reference(xb, wq, bq, wk, bk, wv, bv)
    assert out_b.shape == (B, N2, D)
    assert jnp.allclose(out_b, ref_b, atol=2e-3, rtol=2e-3)

    # 4) convenience wrapper smoke test.
    out_w = feature_attention(x, wq, bq, wk, bk, wv, bv)
    jax.block_until_ready(out_w)
    assert jnp.allclose(out_w, ref, atol=2e-3, rtol=2e-3)

    print("KERNEL_OK")
</pallas_src>

<mosaic_0001>
module attributes {stable_mosaic.version = 11 : i64} {
  func.func @_feature_attention_kernel(%arg0: i32, %arg1: memref<1x8x400xf32, #tpu.memory_space<vmem>>, %arg2: memref<400x1536xf32, #tpu.memory_space<vmem>>, %arg3: memref<1x1536xf32, #tpu.memory_space<vmem>>, %arg4: memref<1x8x512xf32, #tpu.memory_space<vmem>>) attributes {dimension_semantics = [#tpu.dimension_semantics<arbitrary>], iteration_bounds = array<i64: 1>, scalar_prefetch = 0 : i64, scratch_operands = 0 : i64, tpu.core_type = #tpu.core_type<tc>, window_params = [{transform_indices = @transform_0, window_bounds = array<i64: 1, 8, 400>}, {pipeline_mode = #tpu.pipeline_mode<synchronous>, transform_indices = @transform_1, window_bounds = array<i64: 400, 1536>}, {pipeline_mode = #tpu.pipeline_mode<synchronous>, transform_indices = @transform_2, window_bounds = array<i64: 1, 1536>}, {transform_indices = @transform_3, window_bounds = array<i64: 1, 8, 512>}]} {
    %c0 = arith.constant 0 : index
    %c0_0 = arith.constant 0 : index
    %c0_1 = arith.constant 0 : index
    %0 = vector.load %arg1[%c0, %c0_0, %c0_1] : memref<1x8x400xf32, #tpu.memory_space<vmem>>, vector<1x8x400xf32>
    %1 = vector.shape_cast %0 : vector<1x8x400xf32> to vector<8x400xf32>
    %c0_2 = arith.constant 0 : index
    %c0_3 = arith.constant 0 : index
    %2 = vector.load %arg2[%c0_2, %c0_3] : memref<400x1536xf32, #tpu.memory_space<vmem>>, vector<400x1536xf32>
    %cst = arith.constant dense<0.000000e+00> : vector<8x1536xf32>
    %3 = tpu.matmul %1, %2, %cst {dimension_numbers = #tpu.dot_dimension_numbers<[1], [0], [0], [1], [0, 0, 1, 1], [], []>} : vector<8x400xf32>, vector<400x1536xf32>, vector<8x1536xf32> -> vector<8x1536xf32>
    %c0_4 = arith.constant 0 : index
    %c0_5 = arith.constant 0 : index
    %4 = vector.load %arg3[%c0_4, %c0_5] : memref<1x1536xf32, #tpu.memory_space<vmem>>, vector<1x1536xf32>
    %5 = vector.broadcast %4 : vector<1x1536xf32> to vector<8x1536xf32>
    %6 = arith.addf %3, %5 : vector<8x1536xf32>
    %7 = vector.shape_cast %6 : vector<8x1536xf32> to vector<1x8x1536xf32>
    %8 = vector.extract_strided_slice %7 {offsets = [0, 0, 0], sizes = [1, 8, 512], strides = [1, 1, 1]} : vector<1x8x1536xf32> to vector<1x8x512xf32>
    %9 = vector.extract_strided_slice %7 {offsets = [0, 0, 512], sizes = [1, 8, 512], strides = [1, 1, 1]} : vector<1x8x1536xf32> to vector<1x8x512xf32>
    %10 = vector.extract_strided_slice %7 {offsets = [0, 0, 1024], sizes = [1, 8, 512], strides = [1, 1, 1]} : vector<1x8x1536xf32> to vector<1x8x512xf32>
    "tpu.trace_start"() <{level = 10 : i32, message = "bnd,bmd->bnm"}> : () -> ()
    %cst_6 = arith.constant dense<0.000000e+00> : vector<1x8x8xf32>
    %11 = tpu.matmul %8, %9, %cst_6 {dimension_numbers = #tpu.dot_dimension_numbers<[2], [2], [1], [1], [0, 0, 0, 1, 1, 1], [0], [0]>} : vector<1x8x512xf32>, vector<1x8x512xf32>, vector<1x8x8xf32> -> vector<1x8x8xf32>
    "tpu.trace_stop"() : () -> ()
    %cst_7 = arith.constant dense<0xFF800000> : vector<1x8xf32>
    %12 = vector.multi_reduction <maximumf>, %11, %cst_7 [2] : vector<1x8x8xf32> to vector<1x8xf32>
    %13 = vector.shape_cast %12 : vector<1x8xf32> to vector<1x8x1xf32>
    %14 = vector.broadcast %13 : vector<1x8x1xf32> to vector<1x8x8xf32>
    %15 = arith.subf %11, %14 : vector<1x8x8xf32>
    %16 = math.exp %15 : vector<1x8x8xf32>
    %cst_8 = arith.constant dense<0.000000e+00> : vector<1x8xf32>
    %17 = vector.multi_reduction <add>, %16, %cst_8 [2] : vector<1x8x8xf32> to vector<1x8xf32>
    %18 = vector.shape_cast %17 : vector<1x8xf32> to vector<1x8x1xf32>
    %19 = vector.broadcast %18 : vector<1x8x1xf32> to vector<1x8x8xf32>
    %20 = arith.divf %16, %19 : vector<1x8x8xf32>
    "tpu.trace_start"() <{level = 10 : i32, message = "bnm,bmd->bnd"}> : () -> ()
    %cst_9 = arith.constant dense<0.000000e+00> : vector<1x8x512xf32>
    %21 = tpu.matmul %20, %10, %cst_9 {dimension_numbers = #tpu.dot_dimension_numbers<[2], [1], [1], [2], [0, 0, 0, 1, 1, 2], [0], [0]>} : vector<1x8x8xf32>, vector<1x8x512xf32>, vector<1x8x512xf32> -> vector<1x8x512xf32>
    "tpu.trace_stop"() : () -> ()
    %c0_10 = arith.constant 0 : index
    %c0_11 = arith.constant 0 : index
    %c0_12 = arith.constant 0 : index
    %22 = vector.load %arg4[%c0_10, %c0_11, %c0_12] : memref<1x8x512xf32, #tpu.memory_space<vmem>>, vector<1x8x512xf32>
    tpu.vector_store %arg4[%c0_10, %c0_11, %c0_12], %21 {strides = array<i32>} : memref<1x8x512xf32, #tpu.memory_space<vmem>>, vector<1x8x512xf32>,
    return
  }
  func.func @transform_0(%arg0: i32) -> (i32, i32, i32) {
    %c0_i32 = arith.constant 0 : i32
    %c0_i32_0 = arith.constant 0 : i32
    %c0_i32_1 = arith.constant 0 : i32
    return %arg0, %c0_i32, %c0_i32_0 : i32, i32, i32
  }
  func.func @transform_1(%arg0: i32) -> (i32, i32) {
    %c0_i32 = arith.constant 0 : i32
    %c0_i32_0 = arith.constant 0 : i32
    %c0_i32_1 = arith.constant 0 : i32
    return %c0_i32, %c0_i32_0 : i32, i32
  }
  func.func @transform_2(%arg0: i32) -> (i32, i32) {
    %c0_i32 = arith.constant 0 : i32
    %c0_i32_0 = arith.constant 0 : i32
    %c0_i32_1 = arith.constant 0 : i32
    return %c0_i32, %c0_i32_0 : i32, i32
  }
  func.func @transform_3(%arg0: i32) -> (i32, i32, i32) {
    %c0_i32 = arith.constant 0 : i32
    %c0_i32_0 = arith.constant 0 : i32
    %c0_i32_1 = arith.constant 0 : i32
    return %arg0, %c0_i32, %c0_i32_0 : i32, i32, i32
  }
}

</mosaic_0001>

<bundles_post_ra>
// kernel: tpu_custom_call.1
= control target key start
LH: loop header
LB: loop body
LE: loop exit
PB: predicated region body
PF: predicated region fallthrough
CT: control target
= control target key end

     0   :  { %8 = vsyncpa [#allocation3], 0  ;;  %s2182_s0 = inlined_call_operand.hbm [shape: f32[1,8,400], index: 0, kind: input, shape index: {}]   ;;  %s2183_s1 = inlined_call_operand.hbm [shape: f32[400,1536], index: 1, kind: input, shape index: {}]   ;;  %s2184_s2 = inlined_call_operand.hbm [shape: f32[1,1536], index: 2, kind: input, shape index: {}]   ;;  %s2185_s3 = inlined_call_operand.hbm [shape: f32[1,8,512], index: 3, kind: output, shape index: {}]  }
   0x1   :  { %9 = vsyncpa [#allocation6], 0  ;;  %s26_s14 = sshll.u32 %s2183_s1, 4  ;;  %s27_s14 = int_to_ptr.hbm [resolvable:$true] %s26_s14 }
   0x2   :  { %10 = vsyncpa [#allocation4], 0  ;;  %s2000_s15 = smov [#allocation5]   ;;  %s16_s19 = sshll.u32 %s2182_s0, 4  ;;  %s17_s19 = int_to_ptr.hbm [resolvable:$true] %s16_s19 }
   0x3   :  { %s28_s16 = sshll.u32 %s2000_s15, 4  ;;  %s2001_s20 = smov 1536   ;;  %s29_s16 = int_to_ptr.vmem [resolvable:$true] %s28_s16 }
   0x4   :  { %s2002_s21 = smov 96   ;;  %s2003_s22 = smov [#allocation2]  }
   0x5   :  { %34 = dma.hbm_to_vmem [thread:$0]  %s27_s14, 76800, %s29_s16, [#allocation6], %s2001_s20, %s2001_s20, %s2002_s21  }
   0x6   :  { %s18_s23 = sshll.u32 %s2003_s22, 4  ;;  %s40_s26 = sshll.u32 %s2184_s2, 4  ;;  %s19_s23 = int_to_ptr.vmem [resolvable:$true] %s18_s23  ;;  %s41_s26 = int_to_ptr.hbm [resolvable:$true] %s40_s26 }
   0x7   :  { %21 = dma.hbm_to_vmem [thread:$0]  %s17_s19, 512, %s19_s23, [#allocation3]  }
   0x8   :  { %s2004_s1 = smov [#allocation7]  }
   0x9   :  { %s42_s27 = sshll.u32 %s2004_s1, 4  ;;  %s43_s27 = int_to_ptr.vmem [resolvable:$true] %s42_s27 }
   0xa   :  { %45 = dma.hbm_to_vmem [thread:$0]  %s41_s26, 192, %s43_s27, [#allocation6]  }
   0xb   :  { %1994 = dma.done.wait [#allocation3], 512  }
   0xc   :  { %1995 = vsyncadd [#allocation3], 4294966784 }
   0xd   :  { %1996 = dma.done.wait [#allocation6], 76992  }
   0xe   :  { %1997 = vsyncadd [#allocation6], 4294890304  ;;  %v650_v0 = vld [vmem:[#allocation5 + $0x1260] sm:$0xff]  ;;  %v243_v5 = vld [vmem:[#allocation5 + $0x5a8] sm:$0xff]  ;;  %vm690_vm0 = vcmask 130048   ;;  %vm1734_vm1 = vcmask 64512  }
   0xf   :  { %v626_v1 = vld [vmem:[#allocation5 + $0x11a0] sm:$0xff]  ;;  %768 = vmatpush.msra.mxu3 %v650_v0  ;;  %v231_v9 = vld [vmem:[#allocation5 + $0x548] sm:$0xff]  ;;  %v2035_v62 = vld [vmem:[#allocation2 + $0x10] sm:$0xff]  ;;  %s2005_s0 = smov [#allocation8]   ;;  %s1853_s30 = sshll.u32 %s2185_s3, 4  ;;  %s1854_s30 = int_to_ptr.hbm [resolvable:$true] %s1853_s30 }
  0x10   :  { %v638_v2 = vld [vmem:[#allocation5 + $0x1200] sm:$0xff]  ;;  %734 = vmatpush.msra.mxu2 %v626_v1  ;;  %v219_v13 = vld [vmem:[#allocation5 + $0x4e8] sm:$0xff]  ;;  %s1851_s2 = sshll.u32 %s2005_s0, 4  ;;  %s1852_s2 = int_to_ptr.vmem [resolvable:$true] %s1851_s2 }
  0x11   :  { %v242_v3 = vld [vmem:[#allocation5 + $0x5a0] sm:$0xff]  ;;  %769 = vmatpush.msra.mxu3 %v638_v2  ;;  %v207_v17 = vld [vmem:[#allocation5 + $0x488] sm:$0xff] }
  0x12   :  { %v614_v4 = vld [vmem:[#allocation5 + $0x1140] sm:$0xff]  ;;  %694 = vmatpush.msra.mxu0 %v242_v3  ;;  %v195_v21 = vld [vmem:[#allocation5 + $0x428] sm:$0xff]  ;;  %v2040_v3 = vld [vmem:[#allocation2 + $0x18] sm:$0xff] }
  0x13   :  { %v230_v6 = vld [vmem:[#allocation5 + $0x540] sm:$0xff]  ;;  %735 = vmatpush.msra.mxu2 %v614_v4  ;;  %774 = vmatpush.msrb.mxu3 %v243_v5  ;;  %v183_v25 = vld [vmem:[#allocation5 + $0x3c8] sm:$0xff] }
  0x14   :  { %v434_v7 = vld [vmem:[#allocation5 + $0xba0] sm:$0xff]  ;;  %695 = vmatpush.msra.mxu0 %v230_v6  ;;  %v171_v29 = vld [vmem:[#allocation5 + $0x368] sm:$0xff]  ;;  %v244_v6 = vld [vmem:[#allocation5 + $0x5b0] sm:$0xff]  ;;  %1864 = vmatmul.msk.f32.vlgmr.msra.gmra.mxu3 %vm690_vm0, %v2040_v3 }
  0x15   :  { %v602_v8 = vld [vmem:[#allocation5 + $0x10e0] sm:$0xff]  ;;  %714 = vmatpush.msra.mxu1 %v434_v7  ;;  %775 = vmatpush.msrb.mxu3 %v231_v9  ;;  %v159_v33 = vld [vmem:[#allocation5 + $0x308] sm:$0xff] }
  0x16   :  { %v218_v10 = vld [vmem:[#allocation5 + $0x4e0] sm:$0xff]  ;;  %736 = vmatpush.msra.mxu2 %v602_v8  ;;  %v147_v37 = vld [vmem:[#allocation5 + $0x2a8] sm:$0xff] }
  0x17   :  { %v422_v11 = vld [vmem:[#allocation5 + $0xb40] sm:$0xff]  ;;  %696 = vmatpush.msra.mxu0 %v218_v10  ;;  %776 = vmatpush.msrb.mxu3 %v219_v13  ;;  %v135_v41 = vld [vmem:[#allocation5 + $0x248] sm:$0xff] }
  0x18   :  { %v590_v12 = vld [vmem:[#allocation5 + $0x1080] sm:$0xff]  ;;  %715 = vmatpush.msra.mxu1 %v422_v11  ;;  %v123_v45 = vld [vmem:[#allocation5 + $0x1e8] sm:$0xff]  ;;  %v232_v11 = vld [vmem:[#allocation5 + $0x550] sm:$0xff] }
  0x19   :  { %v206_v14 = vld [vmem:[#allocation5 + $0x480] sm:$0xff]  ;;  %737 = vmatpush.msra.mxu2 %v590_v12  ;;  %777 = vmatpush.msrb.mxu3 %v207_v17  ;;  %v111_v49 = vld [vmem:[#allocation5 + $0x188] sm:$0xff]  ;;  %v436_v12 = vld [vmem:[#allocation5 + $0xbb0] sm:$0xff] }
  0x1a   :  { %v410_v15 = vld [vmem:[#allocation5 + $0xae0] sm:$0xff]  ;;  %697 = vmatpush.msra.mxu0 %v206_v14  ;;  %v99_v53 = vld [vmem:[#allocation5 + $0x128] sm:$0xff] }
  0x1b   :  { %v578_v16 = vld [vmem:[#allocation5 + $0x1020] sm:$0xff]  ;;  %716 = vmatpush.msra.mxu1 %v410_v15  ;;  %778 = vmatpush.msrb.mxu3 %v195_v21  ;;  %v87_v57 = vld [vmem:[#allocation5 + $0xc8] sm:$0xff]  ;;  %v220_v15 = vld [vmem:[#allocation5 + $0x4f0] sm:$0xff] }
  0x1c   :  { %v194_v18 = vld [vmem:[#allocation5 + $0x420] sm:$0xff]  ;;  %738 = vmatpush.msra.mxu2 %v578_v16  ;;  %v75_v61 = vld [vmem:[#allocation5 + $0x68] sm:$0xff]  ;;  %v424_v16 = vld [vmem:[#allocation5 + $0xb50] sm:$0xff] }
  0x1d   :  { %v398_v19 = vld [vmem:[#allocation5 + $0xa80] sm:$0xff]  ;;  %698 = vmatpush.msra.mxu0 %v194_v18  ;;  %779 = vmatpush.msrb.mxu3 %v183_v25  ;;  %v63_v1 = vld [vmem:[#allocation5 + $0x8] sm:$0xff] }
  0x1e   :  { %v566_v20 = vld [vmem:[#allocation5 + $0xfc0] sm:$0xff]  ;;  %717 = vmatpush.msra.mxu1 %v398_v19  ;;  %v435_v4 = vld [vmem:[#allocation5 + $0xba8] sm:$0xff]  ;;  %v208_v19 = vld [vmem:[#allocation5 + $0x490] sm:$0xff] }
  0x1f   :  { %v182_v22 = vld [vmem:[#allocation5 + $0x3c0] sm:$0xff]  ;;  %739 = vmatpush.msra.mxu2 %v566_v20  ;;  %780 = vmatpush.msrb.mxu3 %v171_v29  ;;  %v651_v5 = vld [vmem:[#allocation5 + $0x1268] sm:$0xff]  ;;  %v412_v20 = vld [vmem:[#allocation5 + $0xaf0] sm:$0xff] }
  0x20   :  { %v386_v23 = vld [vmem:[#allocation5 + $0xa20] sm:$0xff]  ;;  %699 = vmatpush.msra.mxu0 %v182_v22  ;;  %v423_v8 = vld [vmem:[#allocation5 + $0xb48] sm:$0xff] }
  0x21   :  { %v554_v24 = vld [vmem:[#allocation5 + $0xf60] sm:$0xff]  ;;  %718 = vmatpush.msra.mxu1 %v386_v23  ;;  %781 = vmatpush.msrb.mxu3 %v159_v33  ;;  %v2045_v9 = vld [vmem:[#allocation2 + $0x8] sm:$0xff]  ;;  %v196_v23 = vld [vmem:[#allocation5 + $0x430] sm:$0xff] }
  0x22   :  { %v170_v26 = vld [vmem:[#allocation5 + $0x360] sm:$0xff]  ;;  %740 = vmatpush.msra.mxu2 %v554_v24  ;;  %v639_v10 = vld [vmem:[#allocation5 + $0x1208] sm:$0xff]  ;;  %v400_v24 = vld [vmem:[#allocation5 + $0xa90] sm:$0xff] }
  0x23   :  { %v374_v27 = vld [vmem:[#allocation5 + $0x9c0] sm:$0xff]  ;;  %700 = vmatpush.msra.mxu0 %v170_v26  ;;  %782 = vmatpush.msrb.mxu3 %v147_v37  ;;  %v411_v13 = vld [vmem:[#allocation5 + $0xae8] sm:$0xff] }
  0x24   :  { %v542_v28 = vld [vmem:[#allocation5 + $0xf00] sm:$0xff]  ;;  %719 = vmatpush.msra.mxu1 %v374_v27  ;;  %v627_v14 = vld [vmem:[#allocation5 + $0x11a8] sm:$0xff]  ;;  %v184_v27 = vld [vmem:[#allocation5 + $0x3d0] sm:$0xff] }
  0x25   :  { %v158_v30 = vld [vmem:[#allocation5 + $0x300] sm:$0xff]  ;;  %741 = vmatpush.msra.mxu2 %v542_v28  ;;  %783 = vmatpush.msrb.mxu3 %v135_v41  ;;  %v399_v17 = vld [vmem:[#allocation5 + $0xa88] sm:$0xff]  ;;  %v388_v28 = vld [vmem:[#allocation5 + $0xa30] sm:$0xff] }
  0x26   :  { %v362_v31 = vld [vmem:[#allocation5 + $0x960] sm:$0xff]  ;;  %701 = vmatpush.msra.mxu0 %v158_v30  ;;  %v615_v18 = vld [vmem:[#allocation5 + $0x1148] sm:$0xff] }
  0x27   :  { %v530_v32 = vld [vmem:[#allocation5 + $0xea0] sm:$0xff]  ;;  %720 = vmatpush.msra.mxu1 %v362_v31  ;;  %784 = vmatpush.msrb.mxu3 %v123_v45  ;;  %v387_v21 = vld [vmem:[#allocation5 + $0xa28] sm:$0xff]  ;;  %v172_v31 = vld [vmem:[#allocation5 + $0x370] sm:$0xff] }
  0x28   :  { %v146_v34 = vld [vmem:[#allocation5 + $0x2a0] sm:$0xff]  ;;  %742 = vmatpush.msra.mxu2 %v530_v32  ;;  %v603_v22 = vld [vmem:[#allocation5 + $0x10e8] sm:$0xff]  ;;  %v376_v32 = vld [vmem:[#allocation5 + $0x9d0] sm:$0xff] }
  0x29   :  { %v350_v35 = vld [vmem:[#allocation5 + $0x900] sm:$0xff]  ;;  %702 = vmatpush.msra.mxu0 %v146_v34  ;;  %785 = vmatpush.msrb.mxu3 %v111_v49  ;;  %v375_v25 = vld [vmem:[#allocation5 + $0x9c8] sm:$0xff] }
  0x2a   :  { %v518_v36 = vld [vmem:[#allocation5 + $0xe40] sm:$0xff]  ;;  %721 = vmatpush.msra.mxu1 %v350_v35  ;;  %v591_v26 = vld [vmem:[#allocation5 + $0x1088] sm:$0xff]  ;;  %v160_v35 = vld [vmem:[#allocation5 + $0x310] sm:$0xff] }
  0x2b   :  { %v134_v38 = vld [vmem:[#allocation5 + $0x240] sm:$0xff]  ;;  %743 = vmatpush.msra.mxu2 %v518_v36  ;;  %786 = vmatpush.msrb.mxu3 %v99_v53  ;;  %v363_v29 = vld [vmem:[#allocation5 + $0x968] sm:$0xff]  ;;  %v364_v36 = vld [vmem:[#allocation5 + $0x970] sm:$0xff] }
  0x2c   :  { %v338_v39 = vld [vmem:[#allocation5 + $0x8a0] sm:$0xff]  ;;  %703 = vmatpush.msra.mxu0 %v134_v38  ;;  %v579_v30 = vld [vmem:[#allocation5 + $0x1028] sm:$0xff] }
  0x2d   :  { %v506_v40 = vld [vmem:[#allocation5 + $0xde0] sm:$0xff]  ;;  %722 = vmatpush.msra.mxu1 %v338_v39  ;;  %787 = vmatpush.msrb.mxu3 %v87_v57  ;;  %v351_v33 = vld [vmem:[#allocation5 + $0x908] sm:$0xff]  ;;  %v148_v39 = vld [vmem:[#allocation5 + $0x2b0] sm:$0xff] }
  0x2e   :  { %v122_v42 = vld [vmem:[#allocation5 + $0x1e0] sm:$0xff]  ;;  %744 = vmatpush.msra.mxu2 %v506_v40  ;;  %v567_v34 = vld [vmem:[#allocation5 + $0xfc8] sm:$0xff]  ;;  %v352_v40 = vld [vmem:[#allocation5 + $0x910] sm:$0xff] }
  0x2f   :  { %v326_v43 = vld [vmem:[#allocation5 + $0x840] sm:$0xff]  ;;  %704 = vmatpush.msra.mxu0 %v122_v42  ;;  %788 = vmatpush.msrb.mxu3 %v75_v61  ;;  %v339_v37 = vld [vmem:[#allocation5 + $0x8a8] sm:$0xff] }
  0x30   :  { %v494_v44 = vld [vmem:[#allocation5 + $0xd80] sm:$0xff]  ;;  %723 = vmatpush.msra.mxu1 %v326_v43  ;;  %v555_v38 = vld [vmem:[#allocation5 + $0xf68] sm:$0xff]  ;;  %v136_v43 = vld [vmem:[#allocation5 + $0x250] sm:$0xff] }
  0x31   :  { %v110_v46 = vld [vmem:[#allocation5 + $0x180] sm:$0xff]  ;;  %745 = vmatpush.msra.mxu2 %v494_v44  ;;  %789 = vmatpush.msrb.mxu3 %v63_v1  ;;  %v327_v41 = vld [vmem:[#allocation5 + $0x848] sm:$0xff]  ;;  %v340_v44 = vld [vmem:[#allocation5 + $0x8b0] sm:$0xff] }
  0x32   :  { %v314_v47 = vld [vmem:[#allocation5 + $0x7e0] sm:$0xff]  ;;  %705 = vmatpush.msra.mxu0 %v110_v46  ;;  %v543_v42 = vld [vmem:[#allocation5 + $0xf08] sm:$0xff]  ;;  %v280_v1 = vld [vmem:[#allocation5 + $0x6d0] sm:$0xff] }
  0x33   :  { %v482_v48 = vld [vmem:[#allocation5 + $0xd20] sm:$0xff]  ;;  %724 = vmatpush.msra.mxu1 %v314_v47  ;;  %854 = vmatpush.msra.mxu3 %v244_v6  ;;  %v315_v45 = vld [vmem:[#allocation5 + $0x7e8] sm:$0xff]  ;;  %v124_v47 = vld [vmem:[#allocation5 + $0x1f0] sm:$0xff] }
  0x34   :  { %v98_v50 = vld [vmem:[#allocation5 + $0x120] sm:$0xff]  ;;  %746 = vmatpush.msra.mxu2 %v482_v48  ;;  %v531_v46 = vld [vmem:[#allocation5 + $0xea8] sm:$0xff]  ;;  %v328_v48 = vld [vmem:[#allocation5 + $0x850] sm:$0xff] }
  0x35   :  { %v302_v51 = vld [vmem:[#allocation5 + $0x780] sm:$0xff]  ;;  %706 = vmatpush.msra.mxu0 %v98_v50  ;;  %855 = vmatpush.msra.mxu3 %v232_v11  ;;  %v303_v49 = vld [vmem:[#allocation5 + $0x788] sm:$0xff]  ;;  %v64_v6 = vld [vmem:[#allocation5 + $0x10] sm:$0xff] }
  0x36   :  { %v470_v52 = vld [vmem:[#allocation5 + $0xcc0] sm:$0xff]  ;;  %725 = vmatpush.msra.mxu1 %v302_v51  ;;  %v519_v50 = vld [vmem:[#allocation5 + $0xe48] sm:$0xff]  ;;  %v112_v51 = vld [vmem:[#allocation5 + $0x190] sm:$0xff] }
  0x37   :  { %v86_v54 = vld [vmem:[#allocation5 + $0xc0] sm:$0xff]  ;;  %747 = vmatpush.msra.mxu2 %v470_v52  ;;  %856 = vmatpush.msra.mxu3 %v220_v15  ;;  %v316_v52 = vld [vmem:[#allocation5 + $0x7f0] sm:$0xff]  ;;  %v291_v53 = vld [vmem:[#allocation5 + $0x728] sm:$0xff] }
  0x38   :  { %v290_v55 = vld [vmem:[#allocation5 + $0x720] sm:$0xff]  ;;  %707 = vmatpush.msra.mxu0 %v86_v54  ;;  %v507_v54 = vld [vmem:[#allocation5 + $0xde8] sm:$0xff] }
  0x39   :  { %v458_v56 = vld [vmem:[#allocation5 + $0xc60] sm:$0xff]  ;;  %726 = vmatpush.msra.mxu1 %v290_v55  ;;  %857 = vmatpush.msra.mxu3 %v208_v19  ;;  %v100_v55 = vld [vmem:[#allocation5 + $0x130] sm:$0xff]  ;;  %v279_v57 = vld [vmem:[#allocation5 + $0x6c8] sm:$0xff] }
  0x3a   :  { %v74_v58 = vld [vmem:[#allocation5 + $0x60] sm:$0xff]  ;;  %748 = vmatpush.msra.mxu2 %v458_v56  ;;  %v304_v56 = vld [vmem:[#allocation5 + $0x790] sm:$0xff]  ;;  %v267_v61 = vld [vmem:[#allocation5 + $0x668] sm:$0xff] }
  0x3b   :  { %v278_v59 = vld [vmem:[#allocation5 + $0x6c0] sm:$0xff]  ;;  %708 = vmatpush.msra.mxu0 %v74_v58  ;;  %858 = vmatpush.msra.mxu3 %v196_v23  ;;  %v495_v58 = vld [vmem:[#allocation5 + $0xd88] sm:$0xff]  ;;  %v221_v19 = vld [vmem:[#allocation5 + $0x4f8] sm:$0xff] }
  0x3c   :  { %v446_v60 = vld [vmem:[#allocation5 + $0xc00] sm:$0xff]  ;;  %727 = vmatpush.msra.mxu1 %v278_v59  ;;  %v88_v59 = vld [vmem:[#allocation5 + $0xd0] sm:$0xff]  ;;  %v459_v11 = vld [vmem:[#allocation5 + $0xc68] sm:$0xff] }
  0x3d   :  { %v62_v63 = vld [vmem:[#allocation5] sm:$0xff]  ;;  %749 = vmatpush.msra.mxu2 %v446_v60  ;;  %859 = vmatpush.msra.mxu3 %v184_v27  ;;  %v292_v60 = vld [vmem:[#allocation5 + $0x730] sm:$0xff]  ;;  %v447_v15 = vld [vmem:[#allocation5 + $0xc08] sm:$0xff] }
  0x3e   :  { %v266_v0 = vld [vmem:[#allocation5 + $0x660] sm:$0xff]  ;;  %750 = vmatmul.f32.vlgmr.msra.gmra.mxu2 %v2035_v62  ;;  %709 = vmatpush.msra.mxu0 %v62_v63  ;;  %v483_v63 = vld [vmem:[#allocation5 + $0xd28] sm:$0xff]  ;;  %v209_v23 = vld [vmem:[#allocation5 + $0x498] sm:$0xff] }
  0x3f   :  { %v2037_v2 = vld [vmem:[#allocation2] sm:$0xff]  ;;  %728 = vmatpush.msra.mxu1 %v266_v0  ;;  %848 = vmatpush.msrb.mxu2 %v651_v5  ;;  %v76_v0 = vld [vmem:[#allocation5 + $0x70] sm:$0xff]  ;;  %v471_v5 = vld [vmem:[#allocation5 + $0xcc8] sm:$0xff] }
  0x40   :  { %710 = vmatmul.f32.vlgmr.msra.gmra.mxu0 %v2037_v2  ;;  %v254_v7 = vld [vmem:[#allocation5 + $0x600] sm:$0xff]  ;;  %860 = vmatpush.msra.mxu3 %v172_v31  ;;  %v197_v27 = vld [vmem:[#allocation5 + $0x438] sm:$0xff] }
  0x41   :  { %794 = vmatpush.msrb.mxu0 %v435_v4  ;;  %729 = vmatpush.msra.mxu1 %v254_v7  ;;  %v255_v4 = vld [vmem:[#allocation5 + $0x608] sm:$0xff]  ;;  %v268_v7 = vld [vmem:[#allocation5 + $0x670] sm:$0xff]  ;;  %v185_v31 = vld [vmem:[#allocation5 + $0x3d8] sm:$0xff] }
  0x42   :  { %730 = vmatmul.f32.vlgmr.msra.gmra.mxu1 %v2045_v9  ;;  %849 = vmatpush.msrb.mxu2 %v639_v10  ;;  %v245_v10 = vld [vmem:[#allocation5 + $0x5b8] sm:$0xff] }
  0x43   :  { %795 = vmatpush.msrb.mxu0 %v423_v8  ;;  %814 = vmatpush.msrb.mxu1 %v627_v14  ;;  %v628_v8 = vld [vmem:[#allocation5 + $0x11b0] sm:$0xff]  ;;  %v233_v14 = vld [vmem:[#allocation5 + $0x558] sm:$0xff] }
  0x44   :  { %874 = vmatpush.msra.mxu2 %v436_v12  ;;  %861 = vmatpush.msra.mxu3 %v160_v35  ;;  %v256_v12 = vld [vmem:[#allocation5 + $0x610] sm:$0xff]  ;;  %v173_v35 = vld [vmem:[#allocation5 + $0x378] sm:$0xff] }
  0x45   :  { %796 = vmatpush.msrb.mxu0 %v411_v13  ;;  %815 = vmatpush.msrb.mxu1 %v615_v18  ;;  %v616_v13 = vld [vmem:[#allocation5 + $0x1150] sm:$0xff] }
  0x46   :  { %875 = vmatpush.msra.mxu2 %v424_v16  ;;  %862 = vmatpush.msra.mxu3 %v148_v39  ;;  %v604_v16 = vld [vmem:[#allocation5 + $0x10f0] sm:$0xff]  ;;  %v161_v39 = vld [vmem:[#allocation5 + $0x318] sm:$0xff] }
  0x47   :  { %797 = vmatpush.msrb.mxu0 %v399_v17  ;;  %816 = vmatpush.msrb.mxu1 %v603_v22  ;;  %v629_v17 = vld [vmem:[#allocation5 + $0x11b8] sm:$0xff]  ;;  %v652_v18 = vld [vmem:[#allocation5 + $0x1270] sm:$0xff] }
  0x48   :  { %876 = vmatpush.msra.mxu2 %v412_v20  ;;  %863 = vmatpush.msra.mxu3 %v136_v43  ;;  %v617_v20 = vld [vmem:[#allocation5 + $0x1158] sm:$0xff]  ;;  %v640_v22 = vld [vmem:[#allocation5 + $0x1210] sm:$0xff] }
  0x49   :  { %798 = vmatpush.msrb.mxu0 %v387_v21  ;;  %817 = vmatpush.msrb.mxu1 %v591_v26  ;;  %v592_v21 = vld [vmem:[#allocation5 + $0x1090] sm:$0xff]  ;;  %v149_v43 = vld [vmem:[#allocation5 + $0x2b8] sm:$0xff] }
  0x4a   :  { %877 = vmatpush.msra.mxu2 %v400_v24  ;;  %864 = vmatpush.msra.mxu3 %v124_v47  ;;  %v605_v24 = vld [vmem:[#allocation5 + $0x10f8] sm:$0xff]  ;;  %v580_v26 = vld [vmem:[#allocation5 + $0x1030] sm:$0xff] }
  0x4b   :  { %799 = vmatpush.msrb.mxu0 %v375_v25  ;;  %818 = vmatpush.msrb.mxu1 %v579_v30  ;;  %v437_v25 = vld [vmem:[#allocation5 + $0xbb8] sm:$0xff]  ;;  %v568_v30 = vld [vmem:[#allocation5 + $0xfd0] sm:$0xff] }
  0x4c   :  { %878 = vmatpush.msra.mxu2 %v388_v28  ;;  %865 = vmatpush.msra.mxu3 %v112_v51  ;;  %v593_v28 = vld [vmem:[#allocation5 + $0x1098] sm:$0xff] }
  0x4d   :  { %800 = vmatpush.msrb.mxu0 %v363_v29  ;;  %819 = vmatpush.msrb.mxu1 %v567_v34  ;;  %v425_v29 = vld [vmem:[#allocation5 + $0xb58] sm:$0xff]  ;;  %v556_v34 = vld [vmem:[#allocation5 + $0xf70] sm:$0xff] }
  0x4e   :  { %879 = vmatpush.msra.mxu2 %v376_v32  ;;  %866 = vmatpush.msra.mxu3 %v100_v55  ;;  %v581_v32 = vld [vmem:[#allocation5 + $0x1038] sm:$0xff] }
  0x4f   :  { %801 = vmatpush.msrb.mxu0 %v351_v33  ;;  %820 = vmatpush.msrb.mxu1 %v555_v38  ;;  %v413_v33 = vld [vmem:[#allocation5 + $0xaf8] sm:$0xff]  ;;  %v544_v38 = vld [vmem:[#allocation5 + $0xf10] sm:$0xff] }
  0x50   :  { %880 = vmatpush.msra.mxu2 %v364_v36  ;;  %867 = vmatpush.msra.mxu3 %v88_v59  ;;  %v569_v36 = vld [vmem:[#allocation5 + $0xfd8] sm:$0xff] }
  0x51   :  { %802 = vmatpush.msrb.mxu0 %v339_v37  ;;  %821 = vmatpush.msrb.mxu1 %v543_v42  ;;  %v401_v37 = vld [vmem:[#allocation5 + $0xa98] sm:$0xff]  ;;  %v532_v42 = vld [vmem:[#allocation5 + $0xeb0] sm:$0xff] }
  0x52   :  { %881 = vmatpush.msra.mxu2 %v352_v40  ;;  %790 = vmatmul.f32.vlgmr.msrb.gmra.mxu3 %v2037_v2  ;;  %v557_v40 = vld [vmem:[#allocation5 + $0xf78] sm:$0xff] }
  0x53   :  { %803 = vmatpush.msrb.mxu0 %v327_v41  ;;  %822 = vmatpush.msrb.mxu1 %v531_v46  ;;  %v389_v41 = vld [vmem:[#allocation5 + $0xa38] sm:$0xff]  ;;  %v520_v46 = vld [vmem:[#allocation5 + $0xe50] sm:$0xff] }
  0x54   :  { %882 = vmatpush.msra.mxu2 %v340_v44  ;;  %868 = vmatpush.msra.mxu3 %v76_v0  ;;  %v545_v44 = vld [vmem:[#allocation5 + $0xf18] sm:$0xff] }
  0x55   :  { %804 = vmatpush.msrb.mxu0 %v315_v45  ;;  %823 = vmatpush.msrb.mxu1 %v519_v50  ;;  %v377_v45 = vld [vmem:[#allocation5 + $0x9d8] sm:$0xff]  ;;  %v508_v50 = vld [vmem:[#allocation5 + $0xdf0] sm:$0xff] }
  0x56   :  { %883 = vmatpush.msra.mxu2 %v328_v48  ;;  %869 = vmatpush.msra.mxu3 %v64_v6  ;;  %v137_v47 = vld [vmem:[#allocation5 + $0x258] sm:$0xff] }
  0x57   :  { %805 = vmatpush.msrb.mxu0 %v303_v49  ;;  %824 = vmatpush.msrb.mxu1 %v507_v54  ;;  %v533_v48 = vld [vmem:[#allocation5 + $0xeb8] sm:$0xff]  ;;  %v496_v54 = vld [vmem:[#allocation5 + $0xd90] sm:$0xff] }
  0x58   :  { %884 = vmatpush.msra.mxu2 %v316_v52  ;;  %934 = vmatpush.msrb.mxu3 %v245_v10  ;;  %v365_v49 = vld [vmem:[#allocation5 + $0x978] sm:$0xff]  ;;  %v448_v10 = vld [vmem:[#allocation5 + $0xc10] sm:$0xff] }
  0x59   :  { %806 = vmatpush.msrb.mxu0 %v291_v53  ;;  %825 = vmatpush.msrb.mxu1 %v495_v58  ;;  %v125_v51 = vld [vmem:[#allocation5 + $0x1f8] sm:$0xff]  ;;  %v484_v58 = vld [vmem:[#allocation5 + $0xd30] sm:$0xff] }
  0x5a   :  { %885 = vmatpush.msra.mxu2 %v304_v56  ;;  %935 = vmatpush.msrb.mxu3 %v233_v14  ;;  %v521_v52 = vld [vmem:[#allocation5 + $0xe58] sm:$0xff] }
  0x5b   :  { %807 = vmatpush.msrb.mxu0 %v279_v57  ;;  %826 = vmatpush.msrb.mxu1 %v483_v63  ;;  %v353_v53 = vld [vmem:[#allocation5 + $0x918] sm:$0xff]  ;;  %v472_v63 = vld [vmem:[#allocation5 + $0xcd0] sm:$0xff] }
  0x5c   :  { %886 = vmatpush.msra.mxu2 %v292_v60  ;;  %936 = vmatpush.msrb.mxu3 %v221_v19  ;;  %v113_v55 = vld [vmem:[#allocation5 + $0x198] sm:$0xff]  ;;  %v234_v19 = vld [vmem:[#allocation5 + $0x560] sm:$0xff] }
  0x5d   :  { %808 = vmatpush.msrb.mxu0 %v267_v61  ;;  %827 = vmatpush.msrb.mxu1 %v471_v5  ;;  %v509_v56 = vld [vmem:[#allocation5 + $0xdf8] sm:$0xff]  ;;  %v460_v5 = vld [vmem:[#allocation5 + $0xc70] sm:$0xff] }
  0x5e   :  { %887 = vmatpush.msra.mxu2 %v280_v1  ;;  %937 = vmatpush.msrb.mxu3 %v209_v23  ;;  %v341_v57 = vld [vmem:[#allocation5 + $0x8b8] sm:$0xff]  ;;  %v222_v23 = vld [vmem:[#allocation5 + $0x500] sm:$0xff] }
  0x5f   :  { %809 = vmatpush.msrb.mxu0 %v255_v4  ;;  %828 = vmatpush.msrb.mxu1 %v459_v11  ;;  %v101_v59 = vld [vmem:[#allocation5 + $0x138] sm:$0xff] }
  0x60   :  { %888 = vmatpush.msra.mxu2 %v268_v7  ;;  %810 = vmatmul.f32.vlgmr.msrb.gmra.mxu0 %v2045_v9  ;;  %v497_v60 = vld [vmem:[#allocation5 + $0xd98] sm:$0xff] }
  0x61   :  { %894 = vmatpush.msra.mxu0 %v628_v8  ;;  %829 = vmatpush.msrb.mxu1 %v447_v15  ;;  %v329_v61 = vld [vmem:[#allocation5 + $0x858] sm:$0xff]  ;;  %v246_v15 = vld [vmem:[#allocation5 + $0x5c0] sm:$0xff] }
  0x62   :  { %889 = vmatpush.msra.mxu2 %v256_v12  ;;  %830 = vmatmul.f32.vlgmr.msrb.gmra.mxu1 %v2035_v62  ;;  %v89_v0 = vld [vmem:[#allocation5 + $0xd8] sm:$0xff] }
  0x63   :  { %895 = vmatpush.msra.mxu0 %v616_v13  ;;  %1865 = vmatmul.msk.f32.vlgmr.msrb.gmra.mxu2 %vm690_vm0, %v2040_v3  ;;  %v317_v1 = vld [vmem:[#allocation5 + $0x7f8] sm:$0xff] }
  0x64   :  { %974 = vmatpush.msrb.mxu2 %v629_v17  ;;  %928 = vmatpush.msra.mxu1 %v652_v18  ;;  %v485_v4 = vld [vmem:[#allocation5 + $0xd38] sm:$0xff] }
  0x65   :  { %896 = vmatpush.msra.mxu0 %v604_v16  ;;  %938 = vmatpush.msrb.mxu3 %v197_v27  ;;  %v77_v6 = vld [vmem:[#allocation5 + $0x78] sm:$0xff]  ;;  %v210_v27 = vld [vmem:[#allocation5 + $0x4a0] sm:$0xff] }
  0x66   :  { %975 = vmatpush.msrb.mxu2 %v617_v20  ;;  %929 = vmatpush.msra.mxu1 %v640_v22  ;;  %v305_v7 = vld [vmem:[#allocation5 + $0x798] sm:$0xff]  ;;  %v438_v20 = vld [vmem:[#allocation5 + $0xbc0] sm:$0xff] }
  0x67   :  { %897 = vmatpush.msra.mxu0 %v592_v21  ;;  %939 = vmatpush.msrb.mxu3 %v185_v31  ;;  %v473_v8 = vld [vmem:[#allocation5 + $0xcd8] sm:$0xff]  ;;  %v654_v21 = vld [vmem:[#allocation5 + $0x1280] sm:$0xff] }
  0x68   :  { %976 = vmatpush.msrb.mxu2 %v605_v24  ;;  %954 = vmatpush.msrb.mxu1 %v437_v25  ;;  %v65_v11 = vld [vmem:[#allocation5 + $0x18] sm:$0xff]  ;;  %v426_v24 = vld [vmem:[#allocation5 + $0xb60] sm:$0xff] }
  0x69   :  { %898 = vmatpush.msra.mxu0 %v580_v26  ;;  %940 = vmatpush.msrb.mxu3 %v173_v35  ;;  %v293_v12 = vld [vmem:[#allocation5 + $0x738] sm:$0xff]  ;;  %v642_v25 = vld [vmem:[#allocation5 + $0x1220] sm:$0xff] }
  0x6a   :  { %977 = vmatpush.msrb.mxu2 %v593_v28  ;;  %955 = vmatpush.msrb.mxu1 %v425_v29  ;;  %v461_v13 = vld [vmem:[#allocation5 + $0xc78] sm:$0xff]  ;;  %v247_v28 = vld [vmem:[#allocation5 + $0x5c8] sm:$0xff]  ;;  %v414_v29 = vld [vmem:[#allocation5 + $0xb00] sm:$0xff] }
  0x6b   :  { %899 = vmatpush.msra.mxu0 %v568_v30  ;;  %941 = vmatpush.msrb.mxu3 %v161_v39  ;;  %v653_v14 = vld [vmem:[#allocation5 + $0x1278] sm:$0xff]  ;;  %v630_v30 = vld [vmem:[#allocation5 + $0x11c0] sm:$0xff] }
  0x6c   :  { %978 = vmatpush.msrb.mxu2 %v581_v32  ;;  %956 = vmatpush.msrb.mxu1 %v413_v33  ;;  %v281_v16 = vld [vmem:[#allocation5 + $0x6d8] sm:$0xff]  ;;  %v198_v31 = vld [vmem:[#allocation5 + $0x440] sm:$0xff]  ;;  %v235_v32 = vld [vmem:[#allocation5 + $0x568] sm:$0xff] }
  0x6d   :  { %900 = vmatpush.msra.mxu0 %v556_v34  ;;  %942 = vmatpush.msrb.mxu3 %v149_v43  ;;  %v449_v17 = vld [vmem:[#allocation5 + $0xc18] sm:$0xff]  ;;  %v402_v33 = vld [vmem:[#allocation5 + $0xaa0] sm:$0xff] }
  0x6e   :  { %979 = vmatpush.msrb.mxu2 %v569_v36  ;;  %957 = vmatpush.msrb.mxu1 %v401_v37  ;;  %v641_v18 = vld [vmem:[#allocation5 + $0x1218] sm:$0xff]  ;;  %v618_v34 = vld [vmem:[#allocation5 + $0x1160] sm:$0xff]  ;;  %v223_v36 = vld [vmem:[#allocation5 + $0x508] sm:$0xff] }
  0x6f   :  { %901 = vmatpush.msra.mxu0 %v544_v38  ;;  %943 = vmatpush.msrb.mxu3 %v137_v47  ;;  %v269_v22 = vld [vmem:[#allocation5 + $0x678] sm:$0xff]  ;;  %v186_v35 = vld [vmem:[#allocation5 + $0x3e0] sm:$0xff] }
  0x70   :  { %980 = vmatpush.msrb.mxu2 %v557_v40  ;;  %958 = vmatpush.msrb.mxu1 %v389_v41  ;;  %v257_v26 = vld [vmem:[#allocation5 + $0x618] sm:$0xff]  ;;  %v390_v37 = vld [vmem:[#allocation5 + $0xa40] sm:$0xff]  ;;  %v211_v40 = vld [vmem:[#allocation5 + $0x4a8] sm:$0xff] }
  0x71   :  { %902 = vmatpush.msra.mxu0 %v532_v42  ;;  %944 = vmatpush.msrb.mxu3 %v125_v51  ;;  %v606_v38 = vld [vmem:[#allocation5 + $0x1100] sm:$0xff] }
  0x72   :  { %981 = vmatpush.msrb.mxu2 %v545_v44  ;;  %959 = vmatpush.msrb.mxu1 %v377_v45  ;;  %v174_v39 = vld [vmem:[#allocation5 + $0x380] sm:$0xff]  ;;  %v199_v44 = vld [vmem:[#allocation5 + $0x448] sm:$0xff] }
  0x73   :  { %903 = vmatpush.msra.mxu0 %v520_v46  ;;  %945 = vmatpush.msrb.mxu3 %v113_v55  ;;  %v378_v41 = vld [vmem:[#allocation5 + $0x9e0] sm:$0xff] }
  0x74   :  { %982 = vmatpush.msrb.mxu2 %v533_v48  ;;  %960 = vmatpush.msrb.mxu1 %v365_v49  ;;  %v594_v42 = vld [vmem:[#allocation5 + $0x10a0] sm:$0xff]  ;;  %v187_v48 = vld [vmem:[#allocation5 + $0x3e8] sm:$0xff] }
  0x75   :  { %904 = vmatpush.msra.mxu0 %v508_v50  ;;  %946 = vmatpush.msrb.mxu3 %v101_v59  ;;  %v162_v43 = vld [vmem:[#allocation5 + $0x320] sm:$0xff] }
  0x76   :  { %983 = vmatpush.msrb.mxu2 %v521_v52  ;;  %961 = vmatpush.msrb.mxu1 %v353_v53  ;;  %v366_v45 = vld [vmem:[#allocation5 + $0x980] sm:$0xff]  ;;  %v175_v52 = vld [vmem:[#allocation5 + $0x388] sm:$0xff] }
  0x77   :  { %905 = vmatpush.msra.mxu0 %v496_v54  ;;  %870 = vmatmul.f32.vlgmr.msra.gmra.mxu3 %v2037_v2  ;;  %v582_v46 = vld [vmem:[#allocation5 + $0x1040] sm:$0xff] }
  0x78   :  { %984 = vmatpush.msrb.mxu2 %v509_v56  ;;  %962 = vmatpush.msrb.mxu1 %v341_v57  ;;  %v150_v47 = vld [vmem:[#allocation5 + $0x2c0] sm:$0xff]  ;;  %v163_v56 = vld [vmem:[#allocation5 + $0x328] sm:$0xff] }
  0x79   :  { %906 = vmatpush.msra.mxu0 %v484_v58  ;;  %947 = vmatpush.msrb.mxu3 %v89_v0  ;;  %v354_v49 = vld [vmem:[#allocation5 + $0x920] sm:$0xff] }
  0x7a   :  { %985 = vmatpush.msrb.mxu2 %v497_v60  ;;  %963 = vmatpush.msrb.mxu1 %v329_v61  ;;  %v570_v50 = vld [vmem:[#allocation5 + $0xfe0] sm:$0xff]  ;;  %v151_v60 = vld [vmem:[#allocation5 + $0x2c8] sm:$0xff] }
  0x7b   :  { %907 = vmatpush.msra.mxu0 %v472_v63  ;;  %890 = vmatmul.f32.vlgmr.msra.gmra.mxu2 %v2045_v9  ;;  %v138_v51 = vld [vmem:[#allocation5 + $0x260] sm:$0xff] }
  0x7c   :  { %964 = vmatpush.msrb.mxu1 %v317_v1  ;;  %986 = vmatpush.msrb.mxu2 %v485_v4  ;;  %v342_v53 = vld [vmem:[#allocation5 + $0x8c0] sm:$0xff]  ;;  %v139_v1 = vld [vmem:[#allocation5 + $0x268] sm:$0xff] }
  0x7d   :  { %908 = vmatpush.msra.mxu0 %v460_v5  ;;  %948 = vmatpush.msrb.mxu3 %v77_v6  ;;  %v558_v54 = vld [vmem:[#allocation5 + $0xf80] sm:$0xff] }
  0x7e   :  { %965 = vmatpush.msrb.mxu1 %v305_v7  ;;  %987 = vmatpush.msrb.mxu2 %v473_v8  ;;  %v126_v55 = vld [vmem:[#allocation5 + $0x200] sm:$0xff]  ;;  %v127_v7 = vld [vmem:[#allocation5 + $0x208] sm:$0xff] }
  0x7f   :  { %909 = vmatpush.msra.mxu0 %v448_v10  ;;  %949 = vmatpush.msrb.mxu3 %v65_v11  ;;  %v330_v57 = vld [vmem:[#allocation5 + $0x860] sm:$0xff] }
  0x80   :  { %966 = vmatpush.msrb.mxu1 %v293_v12  ;;  %988 = vmatpush.msrb.mxu2 %v461_v13  ;;  %v546_v58 = vld [vmem:[#allocation5 + $0xf20] sm:$0xff]  ;;  %v115_v12 = vld [vmem:[#allocation5 + $0x1a8] sm:$0xff] }
  0x81   :  { %1008 = vmatpush.msrb.mxu0 %v653_v14  ;;  %1014 = vmatpush.msra.mxu3 %v246_v15  ;;  %v114_v59 = vld [vmem:[#allocation5 + $0x1a0] sm:$0xff] }
  0x82   :  { %1866 = vmatmul.msk.f32.vlgmr.msra.gmra.mxu1 %vm690_vm0, %v2040_v3  ;;  %950 = vmatmul.f32.vlgmr.msrb.gmra.mxu3 %v2037_v2  ;;  %v318_v61 = vld [vmem:[#allocation5 + $0x800] sm:$0xff] }
  0x83   :  { %967 = vmatpush.msrb.mxu1 %v281_v16  ;;  %989 = vmatpush.msrb.mxu2 %v449_v17  ;;  %v534_v63 = vld [vmem:[#allocation5 + $0xec0] sm:$0xff]  ;;  %v103_v16 = vld [vmem:[#allocation5 + $0x148] sm:$0xff] }
  0x84   :  { %1009 = vmatpush.msrb.mxu0 %v641_v18  ;;  %1015 = vmatpush.msra.mxu3 %v234_v19  ;;  %v102_v0 = vld [vmem:[#allocation5 + $0x140] sm:$0xff]  ;;  %v439_v19 = vld [vmem:[#allocation5 + $0xbc8] sm:$0xff] }
  0x85   :  { %910 = vmatmul.f32.vlgmr.msra.gmra.mxu0 %v2035_v62  ;;  %1088 = vmatpush.msra.mxu2 %v654_v21  ;;  %v306_v4 = vld [vmem:[#allocation5 + $0x7a0] sm:$0xff] }
  0x86   :  { %1034 = vmatpush.msra.mxu0 %v438_v20  ;;  %968 = vmatpush.msrb.mxu1 %v269_v22  ;;  %v522_v5 = vld [vmem:[#allocation5 + $0xe60] sm:$0xff]  ;;  %v91_v20 = vld [vmem:[#allocation5 + $0xe8] sm:$0xff] }
  0x87   :  { %1016 = vmatpush.msra.mxu3 %v222_v23  ;;  %1089 = vmatpush.msra.mxu2 %v642_v25  ;;  %v90_v6 = vld [vmem:[#allocation5 + $0xe0] sm:$0xff]  ;;  %v427_v23 = vld [vmem:[#allocation5 + $0xb68] sm:$0xff] }
  0x88   :  { %1035 = vmatpush.msra.mxu0 %v426_v24  ;;  %969 = vmatpush.msrb.mxu1 %v257_v26  ;;  %v294_v8 = vld [vmem:[#allocation5 + $0x740] sm:$0xff]  ;;  %v79_v24 = vld [vmem:[#allocation5 + $0x88] sm:$0xff] }
  0x89   :  { %990 = vmatmul.f32.vlgmr.msrb.gmra.mxu2 %v2035_v62  ;;  %1017 = vmatpush.msra.mxu3 %v210_v27  ;;  %v510_v10 = vld [vmem:[#allocation5 + $0xe00] sm:$0xff]  ;;  %v631_v25 = vld [vmem:[#allocation5 + $0x11c8] sm:$0xff] }
  0x8a   :  { %1094 = vmatpush.msrb.mxu2 %v247_v28  ;;  %1036 = vmatpush.msra.mxu0 %v414_v29  ;;  %v78_v11 = vld [vmem:[#allocation5 + $0x80] sm:$0xff]  ;;  %v415_v27 = vld [vmem:[#allocation5 + $0xb08] sm:$0xff] }
  0x8b   :  { %1054 = vmatpush.msra.mxu1 %v630_v30  ;;  %1018 = vmatpush.msra.mxu3 %v198_v31  ;;  %v282_v13 = vld [vmem:[#allocation5 + $0x6e0] sm:$0xff]  ;;  %v67_v28 = vld [vmem:[#allocation5 + $0x28] sm:$0xff]  ;;  %v440_v31 = vld [vmem:[#allocation5 + $0xbd0] sm:$0xff] }
  0x8c   :  { %1095 = vmatpush.msrb.mxu2 %v235_v32  ;;  %1037 = vmatpush.msra.mxu0 %v402_v33  ;;  %v498_v14 = vld [vmem:[#allocation5 + $0xda0] sm:$0xff]  ;;  %v619_v29 = vld [vmem:[#allocation5 + $0x1168] sm:$0xff] }
  0x8d   :  { %1055 = vmatpush.msra.mxu1 %v618_v34  ;;  %1019 = vmatpush.msra.mxu3 %v186_v35  ;;  %v66_v15 = vld [vmem:[#allocation5 + $0x20] sm:$0xff]  ;;  %v607_v32 = vld [vmem:[#allocation5 + $0x1108] sm:$0xff]  ;;  %v428_v35 = vld [vmem:[#allocation5 + $0xb70] sm:$0xff] }
  0x8e   :  { %970 = vmatmul.f32.vlgmr.msrb.gmra.mxu1 %v2045_v9  ;;  %1096 = vmatpush.msrb.mxu2 %v223_v36  ;;  %v270_v17 = vld [vmem:[#allocation5 + $0x680] sm:$0xff]  ;;  %v655_v33 = vld [vmem:[#allocation5 + $0x1288] sm:$0xff] }
  0x8f   :  { %1038 = vmatpush.msra.mxu0 %v390_v37  ;;  %1056 = vmatpush.msra.mxu1 %v606_v38  ;;  %v486_v18 = vld [vmem:[#allocation5 + $0xd40] sm:$0xff]  ;;  %v391_v34 = vld [vmem:[#allocation5 + $0xa48] sm:$0xff] }
  0x90   :  { %1020 = vmatpush.msra.mxu3 %v174_v39  ;;  %1097 = vmatpush.msrb.mxu2 %v211_v40  ;;  %v258_v21 = vld [vmem:[#allocation5 + $0x620] sm:$0xff]  ;;  %v595_v36 = vld [vmem:[#allocation5 + $0x10a8] sm:$0xff]  ;;  %v416_v39 = vld [vmem:[#allocation5 + $0xb10] sm:$0xff] }
  0x91   :  { %1039 = vmatpush.msra.mxu0 %v378_v41  ;;  %1057 = vmatpush.msra.mxu1 %v594_v42  ;;  %v474_v22 = vld [vmem:[#allocation5 + $0xce0] sm:$0xff]  ;;  %v643_v37 = vld [vmem:[#allocation5 + $0x1228] sm:$0xff]  ;;  %v248_v40 = vld [vmem:[#allocation5 + $0x5d0] sm:$0xff] }
  0x92   :  { %1867 = vmatmul.msk.f32.vlgmr.msrb.gmra.mxu0 %vm690_vm0, %v2040_v3  ;;  %1021 = vmatpush.msra.mxu3 %v162_v43  ;;  %v462_v26 = vld [vmem:[#allocation5 + $0xc80] sm:$0xff]  ;;  %v379_v38 = vld [vmem:[#allocation5 + $0x9e8] sm:$0xff]  ;;  %v404_v42 = vld [vmem:[#allocation5 + $0xab0] sm:$0xff] }
  0x93   :  { %1098 = vmatpush.msrb.mxu2 %v199_v44  ;;  %1040 = vmatpush.msra.mxu0 %v366_v45  ;;  %v450_v30 = vld [vmem:[#allocation5 + $0xc20] sm:$0xff]  ;;  %v583_v41 = vld [vmem:[#allocation5 + $0x1048] sm:$0xff]  ;;  %v236_v43 = vld [vmem:[#allocation5 + $0x570] sm:$0xff] }
  0x94   :  { %1058 = vmatpush.msra.mxu1 %v582_v46  ;;  %1022 = vmatpush.msra.mxu3 %v150_v47  ;;  %v571_v44 = vld [vmem:[#allocation5 + $0xfe8] sm:$0xff]  ;;  %v392_v46 = vld [vmem:[#allocation5 + $0xa50] sm:$0xff] }
  0x95   :  { %1099 = vmatpush.msrb.mxu2 %v187_v48  ;;  %1041 = vmatpush.msra.mxu0 %v354_v49  ;;  %v355_v45 = vld [vmem:[#allocation5 + $0x928] sm:$0xff]  ;;  %v380_v49 = vld [vmem:[#allocation5 + $0x9f0] sm:$0xff] }
  0x96   :  { %1059 = vmatpush.msra.mxu1 %v570_v50  ;;  %1023 = vmatpush.msra.mxu3 %v138_v51  ;;  %v559_v47 = vld [vmem:[#allocation5 + $0xf88] sm:$0xff]  ;;  %v212_v50 = vld [vmem:[#allocation5 + $0x4b0] sm:$0xff] }
  0x97   :  { %1100 = vmatpush.msrb.mxu2 %v175_v52  ;;  %1042 = vmatpush.msra.mxu0 %v342_v53  ;;  %v343_v48 = vld [vmem:[#allocation5 + $0x8c8] sm:$0xff]  ;;  %v368_v52 = vld [vmem:[#allocation5 + $0x990] sm:$0xff] }
  0x98   :  { %1060 = vmatpush.msra.mxu1 %v558_v54  ;;  %1024 = vmatpush.msra.mxu3 %v126_v55  ;;  %v547_v51 = vld [vmem:[#allocation5 + $0xf28] sm:$0xff]  ;;  %v200_v53 = vld [vmem:[#allocation5 + $0x450] sm:$0xff] }
  0x99   :  { %1101 = vmatpush.msrb.mxu2 %v163_v56  ;;  %1043 = vmatpush.msra.mxu0 %v330_v57  ;;  %v535_v54 = vld [vmem:[#allocation5 + $0xec8] sm:$0xff]  ;;  %v356_v56 = vld [vmem:[#allocation5 + $0x930] sm:$0xff] }
  0x9a   :  { %1061 = vmatpush.msra.mxu1 %v546_v58  ;;  %1025 = vmatpush.msra.mxu3 %v114_v59  ;;  %v319_v55 = vld [vmem:[#allocation5 + $0x808] sm:$0xff]  ;;  %v188_v57 = vld [vmem:[#allocation5 + $0x3f0] sm:$0xff] }
  0x9b   :  { %1102 = vmatpush.msrb.mxu2 %v151_v60  ;;  %1044 = vmatpush.msra.mxu0 %v318_v61  ;;  %v523_v58 = vld [vmem:[#allocation5 + $0xe68] sm:$0xff]  ;;  %v344_v60 = vld [vmem:[#allocation5 + $0x8d0] sm:$0xff] }
  0x9c   :  { %1062 = vmatpush.msra.mxu1 %v534_v63  ;;  %1026 = vmatpush.msra.mxu3 %v102_v0  ;;  %v307_v59 = vld [vmem:[#allocation5 + $0x7a8] sm:$0xff]  ;;  %v176_v61 = vld [vmem:[#allocation5 + $0x390] sm:$0xff] }
  0x9d   :  { %1103 = vmatpush.msrb.mxu2 %v139_v1  ;;  %1045 = vmatpush.msra.mxu0 %v306_v4  ;;  %v511_v63 = vld [vmem:[#allocation5 + $0xe08] sm:$0xff]  ;;  %v332_v1 = vld [vmem:[#allocation5 + $0x870] sm:$0xff] }
  0x9e   :  { %1063 = vmatpush.msra.mxu1 %v522_v5  ;;  %1027 = vmatpush.msra.mxu3 %v90_v6  ;;  %v295_v0 = vld [vmem:[#allocation5 + $0x748] sm:$0xff]  ;;  %v164_v4 = vld [vmem:[#allocation5 + $0x330] sm:$0xff] }
  0x9f   :  { %1104 = vmatpush.msrb.mxu2 %v127_v7  ;;  %1046 = vmatpush.msra.mxu0 %v294_v8  ;;  %v499_v5 = vld [vmem:[#allocation5 + $0xda8] sm:$0xff]  ;;  %v320_v7 = vld [vmem:[#allocation5 + $0x810] sm:$0xff] }
  0xa0   :  { %1064 = vmatpush.msra.mxu1 %v510_v10  ;;  %1028 = vmatpush.msra.mxu3 %v78_v11  ;;  %v283_v6 = vld [vmem:[#allocation5 + $0x6e8] sm:$0xff]  ;;  %v152_v8 = vld [vmem:[#allocation5 + $0x2d0] sm:$0xff] }
  0xa1   :  { %1105 = vmatpush.msrb.mxu2 %v115_v12  ;;  %1047 = vmatpush.msra.mxu0 %v282_v13  ;;  %v487_v10 = vld [vmem:[#allocation5 + $0xd48] sm:$0xff]  ;;  %v308_v12 = vld [vmem:[#allocation5 + $0x7b0] sm:$0xff] }
  0xa2   :  { %1065 = vmatpush.msra.mxu1 %v498_v14  ;;  %1029 = vmatpush.msra.mxu3 %v66_v15  ;;  %v271_v11 = vld [vmem:[#allocation5 + $0x688] sm:$0xff]  ;;  %v140_v13 = vld [vmem:[#allocation5 + $0x270] sm:$0xff] }
  0xa3   :  { %1106 = vmatpush.msrb.mxu2 %v103_v16  ;;  %1030 = vmatmul.f32.vlgmr.msra.gmra.mxu3 %v2037_v2  ;;  %v403_v2 = vld [vmem:[#allocation5 + $0xaa8] sm:$0xff]  ;;  %v128_v16 = vld [vmem:[#allocation5 + $0x210] sm:$0xff] }
  0xa4   :  { %1048 = vmatpush.msra.mxu0 %v270_v17  ;;  %1066 = vmatpush.msra.mxu1 %v486_v18  ;;  %v475_v14 = vld [vmem:[#allocation5 + $0xce8] sm:$0xff]  ;;  %v296_v17 = vld [vmem:[#allocation5 + $0x750] sm:$0xff]  ;;  %v2068_v18 = vld [vmem:[#allocation2] sm:$0xff] }
  0xa5   :  { %1114 = vmatpush.msrb.mxu3 %v439_v19  ;;  %1107 = vmatpush.msrb.mxu2 %v91_v20  ;;  %v259_v15 = vld [vmem:[#allocation5 + $0x628] sm:$0xff]  ;;  %v632_v20 = vld [vmem:[#allocation5 + $0x11d0] sm:$0xff] }
  0xa6   :  { %1049 = vmatpush.msra.mxu0 %v258_v21  ;;  %1067 = vmatpush.msra.mxu1 %v474_v22  ;;  %v463_v19 = vld [vmem:[#allocation5 + $0xc88] sm:$0xff]  ;;  %v116_v21 = vld [vmem:[#allocation5 + $0x1b0] sm:$0xff] }
  0xa7   :  { %1115 = vmatpush.msrb.mxu3 %v427_v23  ;;  %1108 = vmatpush.msrb.mxu2 %v79_v24  ;;  %v284_v22 = vld [vmem:[#allocation5 + $0x6f0] sm:$0xff]  ;;  %v451_v23 = vld [vmem:[#allocation5 + $0xc28] sm:$0xff] }
  0xa8   :  { %1134 = vmatpush.msrb.mxu0 %v631_v25  ;;  %1068 = vmatpush.msra.mxu1 %v462_v26  ;;  %v2071_v24 = vld [vmem:[#allocation2 + $0x8] sm:$0xff]  ;;  %v620_v25 = vld [vmem:[#allocation5 + $0x1170] sm:$0xff] }
  0xa9   :  { %1116 = vmatpush.msrb.mxu3 %v415_v27  ;;  %1109 = vmatpush.msrb.mxu2 %v67_v28  ;;  %v104_v26 = vld [vmem:[#allocation5 + $0x150] sm:$0xff] }
  0xaa   :  { %1135 = vmatpush.msrb.mxu0 %v619_v29  ;;  %1069 = vmatpush.msra.mxu1 %v450_v30  ;;  %v272_v27 = vld [vmem:[#allocation5 + $0x690] sm:$0xff] }
  0xab   :  { %1868 = vmatmul.msk.f32.vlgmr.msra.gmra.mxu2 %vm690_vm0, %v2040_v3  ;;  %1117 = vmatpush.msrb.mxu3 %v403_v2  ;;  %v367_v3 = vld [vmem:[#allocation5 + $0x988] sm:$0xff]  ;;  %v656_v28 = vld [vmem:[#allocation5 + $0x1290] sm:$0xff] }
  0xac   :  { %1194 = vmatpush.msra.mxu2 %v440_v31  ;;  %1136 = vmatpush.msrb.mxu0 %v607_v32  ;;  %v608_v29 = vld [vmem:[#allocation5 + $0x1110] sm:$0xff] }
  0xad   :  { %1168 = vmatpush.msrb.mxu1 %v655_v33  ;;  %1050 = vmatmul.f32.vlgmr.msra.gmra.mxu0 %v2045_v9  ;;  %v224_v9 = vld [vmem:[#allocation5 + $0x510] sm:$0xff]  ;;  %v249_v33 = vld [vmem:[#allocation5 + $0x5d8] sm:$0xff] }
  0xae   :  { %1118 = vmatpush.msrb.mxu3 %v391_v34  ;;  %1195 = vmatpush.msra.mxu2 %v428_v35  ;;  %v92_v30 = vld [vmem:[#allocation5 + $0xf0] sm:$0xff]  ;;  %v633_v34 = vld [vmem:[#allocation5 + $0x11d8] sm:$0xff] }
  0xaf   :  { %1137 = vmatpush.msrb.mxu0 %v595_v36  ;;  %1169 = vmatpush.msrb.mxu1 %v643_v37  ;;  %v260_v2 = vld [vmem:[#allocation5 + $0x630] sm:$0xff] }
  0xb0   :  { %1119 = vmatpush.msrb.mxu3 %v379_v38  ;;  %1070 = vmatmul.f32.vlgmr.msra.gmra.mxu1 %v2035_v62  ;;  %v331_v62 = vld [vmem:[#allocation5 + $0x868] sm:$0xff]  ;;  %v644_v31 = vld [vmem:[#allocation5 + $0x1230] sm:$0xff]  ;;  %v237_v38 = vld [vmem:[#allocation5 + $0x578] sm:$0xff] }
  0xb1   :  { %1196 = vmatpush.msra.mxu2 %v416_v39  ;;  %1174 = vmatpush.msra.mxu1 %v248_v40  ;;  %v596_v32 = vld [vmem:[#allocation5 + $0x10b0] sm:$0xff]  ;;  %v621_v39 = vld [vmem:[#allocation5 + $0x1178] sm:$0xff] }
  0xb2   :  { %1138 = vmatpush.msrb.mxu0 %v583_v41  ;;  %1120 = vmatpush.msrb.mxu3 %v367_v3  ;;  %v80_v35 = vld [vmem:[#allocation5 + $0x90] sm:$0xff]  ;;  %v225_v3 = vld [vmem:[#allocation5 + $0x518] sm:$0xff] }
  0xb3   :  { %1197 = vmatpush.msra.mxu2 %v404_v42  ;;  %1175 = vmatpush.msra.mxu1 %v236_v43  ;;  %v584_v36 = vld [vmem:[#allocation5 + $0x1050] sm:$0xff]  ;;  %v441_v42 = vld [vmem:[#allocation5 + $0xbd8] sm:$0xff] }
  0xb4   :  { %1139 = vmatpush.msrb.mxu0 %v571_v44  ;;  %1121 = vmatpush.msrb.mxu3 %v355_v45  ;;  %v2074_v37 = vld [vmem:[#allocation2 + $0x10] sm:$0xff]  ;;  %v609_v43 = vld [vmem:[#allocation5 + $0x1118] sm:$0xff] }
  0xb5   :  { %1198 = vmatpush.msra.mxu2 %v392_v46  ;;  %1176 = vmatpush.msra.mxu1 %v224_v9  ;;  %v68_v40 = vld [vmem:[#allocation5 + $0x30] sm:$0xff]  ;;  %v213_v45 = vld [vmem:[#allocation5 + $0x4b8] sm:$0xff] }
  0xb6   :  { %1140 = vmatpush.msrb.mxu0 %v559_v47  ;;  %1122 = vmatpush.msrb.mxu3 %v343_v48  ;;  %v572_v41 = vld [vmem:[#allocation5 + $0xff0] sm:$0xff]  ;;  %v2077_v46 = vld [vmem:[#allocation2 + $0x18] sm:$0xff] }
  0xb7   :  { %1199 = vmatpush.msra.mxu2 %v380_v49  ;;  %1177 = vmatpush.msra.mxu1 %v212_v50  ;;  %v560_v44 = vld [vmem:[#allocation5 + $0xf90] sm:$0xff]  ;;  %v429_v9 = vld [vmem:[#allocation5 + $0xb78] sm:$0xff] }
  0xb8   :  { %1141 = vmatpush.msrb.mxu0 %v547_v51  ;;  %1123 = vmatpush.msrb.mxu3 %v331_v62  ;;  %v597_v47 = vld [vmem:[#allocation5 + $0x10b8] sm:$0xff]  ;;  %v548_v48 = vld [vmem:[#allocation5 + $0xf30] sm:$0xff] }
  0xb9   :  { %1200 = vmatpush.msra.mxu2 %v368_v52  ;;  %1178 = vmatpush.msra.mxu1 %v200_v53  ;;  %v201_v49 = vld [vmem:[#allocation5 + $0x458] sm:$0xff]  ;;  %v536_v62 = vld [vmem:[#allocation5 + $0xed0] sm:$0xff] }
  0xba   :  { %1142 = vmatpush.msrb.mxu0 %v535_v54  ;;  %1124 = vmatpush.msrb.mxu3 %v319_v55  ;;  %v417_v50 = vld [vmem:[#allocation5 + $0xb18] sm:$0xff]  ;;  %v524_v55 = vld [vmem:[#allocation5 + $0xe70] sm:$0xff] }
  0xbb   :  { %1201 = vmatpush.msra.mxu2 %v356_v56  ;;  %1179 = vmatpush.msra.mxu1 %v188_v57  ;;  %v585_v51 = vld [vmem:[#allocation5 + $0x1058] sm:$0xff] }
  0xbc   :  { %1143 = vmatpush.msrb.mxu0 %v523_v58  ;;  %1125 = vmatpush.msrb.mxu3 %v307_v59  ;;  %v189_v52 = vld [vmem:[#allocation5 + $0x3f8] sm:$0xff]  ;;  %v512_v59 = vld [vmem:[#allocation5 + $0xe10] sm:$0xff] }
  0xbd   :  { %1202 = vmatpush.msra.mxu2 %v344_v60  ;;  %1180 = vmatpush.msra.mxu1 %v176_v61  ;;  %v405_v53 = vld [vmem:[#allocation5 + $0xab8] sm:$0xff] }
  0xbe   :  { %1144 = vmatpush.msrb.mxu0 %v511_v63  ;;  %1126 = vmatpush.msrb.mxu3 %v295_v0  ;;  %v573_v54 = vld [vmem:[#allocation5 + $0xff8] sm:$0xff]  ;;  %v500_v0 = vld [vmem:[#allocation5 + $0xdb0] sm:$0xff] }
  0xbf   :  { %1203 = vmatpush.msra.mxu2 %v332_v1  ;;  %1181 = vmatpush.msra.mxu1 %v164_v4  ;;  %v177_v56 = vld [vmem:[#allocation5 + $0x398] sm:$0xff] }
  0xc0   :  { %1145 = vmatpush.msrb.mxu0 %v499_v5  ;;  %1127 = vmatpush.msrb.mxu3 %v283_v6  ;;  %v393_v57 = vld [vmem:[#allocation5 + $0xa58] sm:$0xff]  ;;  %v488_v6 = vld [vmem:[#allocation5 + $0xd50] sm:$0xff] }
  0xc1   :  { %1204 = vmatpush.msra.mxu2 %v320_v7  ;;  %1182 = vmatpush.msra.mxu1 %v152_v8  ;;  %v561_v58 = vld [vmem:[#allocation5 + $0xf98] sm:$0xff] }
  0xc2   :  { %1146 = vmatpush.msrb.mxu0 %v487_v10  ;;  %1128 = vmatpush.msrb.mxu3 %v271_v11  ;;  %v165_v60 = vld [vmem:[#allocation5 + $0x338] sm:$0xff]  ;;  %v476_v11 = vld [vmem:[#allocation5 + $0xcf0] sm:$0xff] }
  0xc3   :  { %1205 = vmatpush.msra.mxu2 %v308_v12  ;;  %1183 = vmatpush.msra.mxu1 %v140_v13  ;;  %v381_v61 = vld [vmem:[#allocation5 + $0x9f8] sm:$0xff] }
  0xc4   :  { %1110 = vmatmul.f32.vlgmr.msrb.gmra.mxu2 %v2068_v18  ;;  %1147 = vmatpush.msrb.mxu0 %v475_v14  ;;  %v549_v63 = vld [vmem:[#allocation5 + $0xf38] sm:$0xff] }
  0xc5   :  { %1129 = vmatpush.msrb.mxu3 %v259_v15  ;;  %1184 = vmatpush.msra.mxu1 %v128_v16  ;;  %v153_v1 = vld [vmem:[#allocation5 + $0x2d8] sm:$0xff]  ;;  %v464_v15 = vld [vmem:[#allocation5 + $0xc90] sm:$0xff] }
  0xc6   :  { %1206 = vmatpush.msra.mxu2 %v296_v17  ;;  %1130 = vmatmul.f32.vlgmr.msrb.gmra.mxu3 %v2071_v24  ;;  %v369_v4 = vld [vmem:[#allocation5 + $0x998] sm:$0xff] }
  0xc7   :  { %1148 = vmatpush.msrb.mxu0 %v463_v19  ;;  %1214 = vmatpush.msra.mxu3 %v632_v20  ;;  %v537_v5 = vld [vmem:[#allocation5 + $0xed8] sm:$0xff]  ;;  %v452_v20 = vld [vmem:[#allocation5 + $0xc30] sm:$0xff] }
  0xc8   :  { %1185 = vmatpush.msra.mxu1 %v116_v21  ;;  %1207 = vmatpush.msra.mxu2 %v284_v22  ;;  %v141_v7 = vld [vmem:[#allocation5 + $0x278] sm:$0xff] }
  0xc9   :  { %1149 = vmatpush.msrb.mxu0 %v451_v23  ;;  %1215 = vmatpush.msra.mxu3 %v620_v25  ;;  %v357_v8 = vld [vmem:[#allocation5 + $0x938] sm:$0xff] }
  0xca   :  { %1186 = vmatpush.msra.mxu1 %v104_v26  ;;  %1208 = vmatpush.msra.mxu2 %v272_v27  ;;  %v525_v10 = vld [vmem:[#allocation5 + $0xe78] sm:$0xff] }
  0xcb   :  { %1248 = vmatpush.msra.mxu0 %v656_v28  ;;  %1216 = vmatpush.msra.mxu3 %v608_v29  ;;  %v129_v12 = vld [vmem:[#allocation5 + $0x218] sm:$0xff] }
  0xcc   :  { %1187 = vmatpush.msra.mxu1 %v92_v30  ;;  %1209 = vmatpush.msra.mxu2 %v260_v2  ;;  %v345_v13 = vld [vmem:[#allocation5 + $0x8d8] sm:$0xff] }
  0xcd   :  { %1249 = vmatpush.msra.mxu0 %v644_v31  ;;  %1217 = vmatpush.msra.mxu3 %v596_v32  ;;  %v513_v14 = vld [vmem:[#allocation5 + $0xe18] sm:$0xff]  ;;  %v250_v32 = vld [vmem:[#allocation5 + $0x5e0] sm:$0xff] }
  0xce   :  { %1150 = vmatmul.f32.vlgmr.msrb.gmra.mxu0 %v2074_v37  ;;  %1294 = vmatpush.msrb.mxu2 %v633_v34  ;;  %v117_v16 = vld [vmem:[#allocation5 + $0x1b8] sm:$0xff] }
  0xcf   :  { %1254 = vmatpush.msrb.mxu0 %v249_v33  ;;  %1188 = vmatpush.msra.mxu1 %v80_v35  ;;  %v333_v17 = vld [vmem:[#allocation5 + $0x878] sm:$0xff] }
  0xd0   :  { %1218 = vmatpush.msra.mxu3 %v584_v36  ;;  %1295 = vmatpush.msrb.mxu2 %v621_v39  ;;  %v501_v19 = vld [vmem:[#allocation5 + $0xdb8] sm:$0xff]  ;;  %v238_v36 = vld [vmem:[#allocation5 + $0x580] sm:$0xff] }
  0xd1   :  { %1255 = vmatpush.msrb.mxu0 %v237_v38  ;;  %1189 = vmatpush.msra.mxu1 %v68_v40  ;;  %v105_v21 = vld [vmem:[#allocation5 + $0x158] sm:$0xff]  ;;  %v442_v38 = vld [vmem:[#allocation5 + $0xbe0] sm:$0xff] }
  0xd2   :  { %1219 = vmatpush.msra.mxu3 %v572_v41  ;;  %1869 = vmatmul.msk.f32.vlgmr.msrb.gmra.mxu1 %vm690_vm0, %v2077_v46  ;;  %v321_v22 = vld [vmem:[#allocation5 + $0x818] sm:$0xff]  ;;  %v226_v40 = vld [vmem:[#allocation5 + $0x520] sm:$0xff] }
  0xd3   :  { %1256 = vmatpush.msrb.mxu0 %v225_v3  ;;  %1274 = vmatpush.msrb.mxu1 %v441_v42  ;;  %v489_v23 = vld [vmem:[#allocation5 + $0xd58] sm:$0xff]  ;;  %v430_v41 = vld [vmem:[#allocation5 + $0xb80] sm:$0xff] }
  0xd4   :  { %1296 = vmatpush.msrb.mxu2 %v609_v43  ;;  %1220 = vmatpush.msra.mxu3 %v560_v44  ;;  %v657_v25 = vld [vmem:[#allocation5 + $0x1298] sm:$0xff]  ;;  %v214_v42 = vld [vmem:[#allocation5 + $0x4c0] sm:$0xff] }
  0xd5   :  { %1257 = vmatpush.msrb.mxu0 %v213_v45  ;;  %1275 = vmatpush.msrb.mxu1 %v429_v9  ;;  %v93_v26 = vld [vmem:[#allocation5 + $0xf8] sm:$0xff]  ;;  %v418_v43 = vld [vmem:[#allocation5 + $0xb20] sm:$0xff] }
  0xd6   :  { %1297 = vmatpush.msrb.mxu2 %v597_v47  ;;  %1221 = vmatpush.msra.mxu3 %v548_v48  ;;  %v309_v27 = vld [vmem:[#allocation5 + $0x7b8] sm:$0xff]  ;;  %v202_v44 = vld [vmem:[#allocation5 + $0x460] sm:$0xff] }
  0xd7   :  { %1258 = vmatpush.msrb.mxu0 %v201_v49  ;;  %1276 = vmatpush.msrb.mxu1 %v417_v50  ;;  %v477_v28 = vld [vmem:[#allocation5 + $0xcf8] sm:$0xff]  ;;  %v634_v45 = vld [vmem:[#allocation5 + $0x11e0] sm:$0xff] }
  0xd8   :  { %1298 = vmatpush.msrb.mxu2 %v585_v51  ;;  %1222 = vmatpush.msra.mxu3 %v536_v62  ;;  %v645_v29 = vld [vmem:[#allocation5 + $0x1238] sm:$0xff]  ;;  %v406_v9 = vld [vmem:[#allocation5 + $0xac0] sm:$0xff] }
  0xd9   :  { %1259 = vmatpush.msrb.mxu0 %v189_v52  ;;  %1277 = vmatpush.msrb.mxu1 %v405_v53  ;;  %v81_v30 = vld [vmem:[#allocation5 + $0x98] sm:$0xff]  ;;  %v658_v47 = vld [vmem:[#allocation5 + $0x12a0] sm:$0xff] }
  0xda   :  { %1299 = vmatpush.msrb.mxu2 %v573_v54  ;;  %1223 = vmatpush.msra.mxu3 %v524_v55  ;;  %v297_v2 = vld [vmem:[#allocation5 + $0x758] sm:$0xff]  ;;  %v190_v48 = vld [vmem:[#allocation5 + $0x400] sm:$0xff]  ;;  %v251_v54 = vld [vmem:[#allocation5 + $0x5e8] sm:$0xff] }
  0xdb   :  { %1260 = vmatpush.msrb.mxu0 %v177_v56  ;;  %1278 = vmatpush.msrb.mxu1 %v393_v57  ;;  %v465_v31 = vld [vmem:[#allocation5 + $0xc98] sm:$0xff]  ;;  %v622_v49 = vld [vmem:[#allocation5 + $0x1180] sm:$0xff] }
  0xdc   :  { %1300 = vmatpush.msrb.mxu2 %v561_v58  ;;  %1224 = vmatpush.msra.mxu3 %v512_v59  ;;  %v69_v33 = vld [vmem:[#allocation5 + $0x38] sm:$0xff]  ;;  %v394_v50 = vld [vmem:[#allocation5 + $0xa60] sm:$0xff]  ;;  %v239_v58 = vld [vmem:[#allocation5 + $0x588] sm:$0xff] }
  0xdd   :  { %1261 = vmatpush.msrb.mxu0 %v165_v60  ;;  %1279 = vmatpush.msrb.mxu1 %v381_v61  ;;  %v285_v34 = vld [vmem:[#allocation5 + $0x6f8] sm:$0xff]  ;;  %v646_v51 = vld [vmem:[#allocation5 + $0x1240] sm:$0xff] }
  0xde   :  { %1301 = vmatpush.msrb.mxu2 %v549_v63  ;;  %1225 = vmatpush.msra.mxu3 %v500_v0  ;;  %v453_v35 = vld [vmem:[#allocation5 + $0xc38] sm:$0xff]  ;;  %v178_v62 = vld [vmem:[#allocation5 + $0x3a0] sm:$0xff]  ;;  %v227_v63 = vld [vmem:[#allocation5 + $0x528] sm:$0xff] }
  0xdf   :  { %1262 = vmatpush.msrb.mxu0 %v153_v1  ;;  %1280 = vmatpush.msrb.mxu1 %v369_v4  ;;  %v273_v39 = vld [vmem:[#allocation5 + $0x698] sm:$0xff]  ;;  %v610_v52 = vld [vmem:[#allocation5 + $0x1120] sm:$0xff] }
  0xe0   :  { %1302 = vmatpush.msrb.mxu2 %v537_v5  ;;  %1226 = vmatpush.msra.mxu3 %v488_v6  ;;  %v261_v3 = vld [vmem:[#allocation5 + $0x638] sm:$0xff]  ;;  %v382_v53 = vld [vmem:[#allocation5 + $0xa00] sm:$0xff]  ;;  %v215_v5 = vld [vmem:[#allocation5 + $0x4c8] sm:$0xff] }
  0xe1   :  { %1263 = vmatpush.msrb.mxu0 %v141_v7  ;;  %1281 = vmatpush.msrb.mxu1 %v357_v8  ;;  %v166_v55 = vld [vmem:[#allocation5 + $0x340] sm:$0xff] }
  0xe2   :  { %1303 = vmatpush.msrb.mxu2 %v525_v10  ;;  %1227 = vmatpush.msra.mxu3 %v476_v11  ;;  %v598_v56 = vld [vmem:[#allocation5 + $0x10c0] sm:$0xff]  ;;  %v203_v10 = vld [vmem:[#allocation5 + $0x468] sm:$0xff] }
  0xe3   :  { %1264 = vmatpush.msrb.mxu0 %v129_v12  ;;  %1282 = vmatpush.msrb.mxu1 %v345_v13  ;;  %v370_v57 = vld [vmem:[#allocation5 + $0x9a0] sm:$0xff] }
  0xe4   :  { %1304 = vmatpush.msrb.mxu2 %v513_v14  ;;  %1228 = vmatpush.msra.mxu3 %v464_v15  ;;  %v154_v59 = vld [vmem:[#allocation5 + $0x2e0] sm:$0xff]  ;;  %v191_v14 = vld [vmem:[#allocation5 + $0x408] sm:$0xff] }
  0xe5   :  { %1265 = vmatpush.msrb.mxu0 %v117_v16  ;;  %1283 = vmatpush.msrb.mxu1 %v333_v17  ;;  %v586_v60 = vld [vmem:[#allocation5 + $0x1060] sm:$0xff] }
  0xe6   :  { %1305 = vmatpush.msrb.mxu2 %v501_v19  ;;  %1229 = vmatpush.msra.mxu3 %v452_v20  ;;  %v358_v61 = vld [vmem:[#allocation5 + $0x940] sm:$0xff]  ;;  %v179_v19 = vld [vmem:[#allocation5 + $0x3a8] sm:$0xff] }
  0xe7   :  { %1210 = vmatmul.f32.vlgmr.msra.gmra.mxu2 %v2071_v24  ;;  %1266 = vmatpush.msrb.mxu0 %v105_v21  ;;  %v142_v0 = vld [vmem:[#allocation5 + $0x280] sm:$0xff] }
  0xe8   :  { %1284 = vmatpush.msrb.mxu1 %v321_v22  ;;  %1306 = vmatpush.msrb.mxu2 %v489_v23  ;;  %v574_v1 = vld [vmem:[#allocation5 + $0x1000] sm:$0xff]  ;;  %v167_v23 = vld [vmem:[#allocation5 + $0x348] sm:$0xff] }
  0xe9   :  { %1230 = vmatmul.f32.vlgmr.msra.gmra.mxu3 %v2074_v37  ;;  %1870 = vmatmul.msk.f32.vlgmr.msra.gmra.mxu0 %vm690_vm0, %v2077_v46  ;;  %v346_v4 = vld [vmem:[#allocation5 + $0x8e0] sm:$0xff] }
  0xea   :  { %1328 = vmatpush.msrb.mxu3 %v657_v25  ;;  %1267 = vmatpush.msrb.mxu0 %v93_v26  ;;  %v130_v6 = vld [vmem:[#allocation5 + $0x220] sm:$0xff] }
  0xeb   :  { %1285 = vmatpush.msrb.mxu1 %v309_v27  ;;  %1307 = vmatpush.msrb.mxu2 %v477_v28  ;;  %v562_v7 = vld [vmem:[#allocation5 + $0xfa0] sm:$0xff]  ;;  %v155_v28 = vld [vmem:[#allocation5 + $0x2e8] sm:$0xff] }
  0xec   :  { %1190 = vmatmul.f32.vlgmr.msra.gmra.mxu1 %v2068_v18  ;;  %1329 = vmatpush.msrb.mxu3 %v645_v29  ;;  %v334_v8 = vld [vmem:[#allocation5 + $0x880] sm:$0xff] }
  0xed   :  { %1268 = vmatpush.msrb.mxu0 %v81_v30  ;;  %1286 = vmatpush.msrb.mxu1 %v297_v2  ;;  %v118_v11 = vld [vmem:[#allocation5 + $0x1c0] sm:$0xff] }
  0xee   :  { %1308 = vmatpush.msrb.mxu2 %v465_v31  ;;  %1334 = vmatpush.msra.mxu3 %v250_v32  ;;  %v550_v12 = vld [vmem:[#allocation5 + $0xf40] sm:$0xff]  ;;  %v443_v31 = vld [vmem:[#allocation5 + $0xbe8] sm:$0xff] }
  0xef   :  { %1269 = vmatpush.msrb.mxu0 %v69_v33  ;;  %1287 = vmatpush.msrb.mxu1 %v285_v34  ;;  %v322_v13 = vld [vmem:[#allocation5 + $0x820] sm:$0xff]  ;;  %v143_v33 = vld [vmem:[#allocation5 + $0x288] sm:$0xff] }
  0xf0   :  { %1309 = vmatpush.msrb.mxu2 %v453_v35  ;;  %1335 = vmatpush.msra.mxu3 %v238_v36  ;;  %v106_v15 = vld [vmem:[#allocation5 + $0x160] sm:$0xff]  ;;  %v431_v35 = vld [vmem:[#allocation5 + $0xb88] sm:$0xff] }
  0xf1   :  { %1310 = vmatmul.f32.vlgmr.msrb.gmra.mxu2 %v2074_v37  ;;  %1354 = vmatpush.msra.mxu0 %v442_v38  ;;  %v538_v16 = vld [vmem:[#allocation5 + $0xee0] sm:$0xff]  ;;  %v635_v36 = vld [vmem:[#allocation5 + $0x11e8] sm:$0xff] }
  0xf2   :  { %1288 = vmatpush.msrb.mxu1 %v273_v39  ;;  %1336 = vmatpush.msra.mxu3 %v226_v40  ;;  %v310_v17 = vld [vmem:[#allocation5 + $0x7c0] sm:$0xff]  ;;  %v419_v39 = vld [vmem:[#allocation5 + $0xb28] sm:$0xff] }
  0xf3   :  { %1270 = vmatmul.f32.vlgmr.msrb.gmra.mxu0 %v2068_v18  ;;  %1871 = vmatmul.msk.f32.vlgmr.msrb.gmra.mxu3 %vm690_vm0, %v2077_v46  ;;  %v94_v20 = vld [vmem:[#allocation5 + $0x100] sm:$0xff]  ;;  %v623_v40 = vld [vmem:[#allocation5 + $0x1188] sm:$0xff] }
  0xf4   :  { %1355 = vmatpush.msra.mxu0 %v430_v41  ;;  %1289 = vmatpush.msrb.mxu1 %v261_v3  ;;  %v526_v21 = vld [vmem:[#allocation5 + $0xe80] sm:$0xff]  ;;  %v407_v3 = vld [vmem:[#allocation5 + $0xac8] sm:$0xff] }
  0xf5   :  { %1337 = vmatpush.msra.mxu3 %v214_v42  ;;  %1290 = vmatmul.f32.vlgmr.msrb.gmra.mxu1 %v2071_v24  ;;  %v298_v22 = vld [vmem:[#allocation5 + $0x760] sm:$0xff]  ;;  %v131_v42 = vld [vmem:[#allocation5 + $0x228] sm:$0xff] }
  0xf6   :  { %1356 = vmatpush.msra.mxu0 %v418_v43  ;;  %1374 = vmatpush.msra.mxu1 %v634_v45  ;;  %v82_v25 = vld [vmem:[#allocation5 + $0xa0] sm:$0xff]  ;;  %v611_v43 = vld [vmem:[#allocation5 + $0x1128] sm:$0xff] }
  0xf7   :  { %1338 = vmatpush.msra.mxu3 %v202_v44  ;;  %1408 = vmatpush.msra.mxu2 %v658_v47  ;;  %v514_v26 = vld [vmem:[#allocation5 + $0xe20] sm:$0xff]  ;;  %v395_v44 = vld [vmem:[#allocation5 + $0xa68] sm:$0xff] }
  0xf8   :  { %1357 = vmatpush.msra.mxu0 %v406_v9  ;;  %1375 = vmatpush.msra.mxu1 %v622_v49  ;;  %v286_v27 = vld [vmem:[#allocation5 + $0x700] sm:$0xff]  ;;  %v599_v9 = vld [vmem:[#allocation5 + $0x10c8] sm:$0xff] }
  0xf9   :  { %1339 = vmatpush.msra.mxu3 %v190_v48  ;;  %1409 = vmatpush.msra.mxu2 %v646_v51  ;;  %v70_v29 = vld [vmem:[#allocation5 + $0x40] sm:$0xff]  ;;  %v119_v47 = vld [vmem:[#allocation5 + $0x1c8] sm:$0xff] }
  0xfa   :  { %1358 = vmatpush.msra.mxu0 %v394_v50  ;;  %1376 = vmatpush.msra.mxu1 %v610_v52  ;;  %v502_v30 = vld [vmem:[#allocation5 + $0xdc0] sm:$0xff]  ;;  %v383_v48 = vld [vmem:[#allocation5 + $0xa08] sm:$0xff] }
  0xfb   :  { %1340 = vmatpush.msra.mxu3 %v178_v62  ;;  %1414 = vmatpush.msrb.mxu2 %v251_v54  ;;  %v274_v2 = vld [vmem:[#allocation5 + $0x6a0] sm:$0xff]  ;;  %v659_v49 = vld [vmem:[#allocation5 + $0x12a8] sm:$0xff] }
  0xfc   :  { %1359 = vmatpush.msra.mxu0 %v382_v53  ;;  %1377 = vmatpush.msra.mxu1 %v598_v56  ;;  %v490_v32 = vld [vmem:[#allocation5 + $0xd60] sm:$0xff]  ;;  %v587_v50 = vld [vmem:[#allocation5 + $0x1068] sm:$0xff] }
  0xfd   :  { %1341 = vmatpush.msra.mxu3 %v166_v55  ;;  %1415 = vmatpush.msrb.mxu2 %v239_v58  ;;  %v262_v34 = vld [vmem:[#allocation5 + $0x640] sm:$0xff]  ;;  %v107_v51 = vld [vmem:[#allocation5 + $0x168] sm:$0xff] }
  0xfe   :  { %1360 = vmatpush.msra.mxu0 %v370_v57  ;;  %1378 = vmatpush.msra.mxu1 %v586_v60  ;;  %v478_v38 = vld [vmem:[#allocation5 + $0xd00] sm:$0xff]  ;;  %v371_v62 = vld [vmem:[#allocation5 + $0x9a8] sm:$0xff]  ;;  %v240_v60 = vld [vmem:[#allocation5 + $0x590] sm:$0xff] }
  0xff   :  { %1342 = vmatpush.msra.mxu3 %v154_v59  ;;  %1416 = vmatpush.msrb.mxu2 %v227_v63  ;;  %v466_v41 = vld [vmem:[#allocation5 + $0xca0] sm:$0xff]  ;;  %v647_v52 = vld [vmem:[#allocation5 + $0x1248] sm:$0xff]  ;;  %v2096_v63 = vpop.f32.mrf.mxu3 }
 0x100   :  { %1361 = vmatpush.msra.mxu0 %v358_v61  ;;  %1379 = vmatpush.msra.mxu1 %v574_v1  ;;  %v454_v45 = vld [vmem:[#allocation5 + $0xc40] sm:$0xff]  ;;  %v575_v53 = vld [vmem:[#allocation5 + $0x1008] sm:$0xff]  ;;  %v2094_v61 = vpop.f32.mrf.mxu2 }
 0x101   :  { %1343 = vmatpush.msra.mxu3 %v142_v0  ;;  %1417 = vmatpush.msrb.mxu2 %v215_v5  ;;  %v359_v54 = vld [vmem:[#allocation5 + $0x948] sm:$0xff]  ;;  %v228_v5 = vld [vmem:[#allocation5 + $0x530] sm:$0xff] }
 0x102   :  { %1362 = vmatpush.msra.mxu0 %v346_v4  ;;  %1380 = vmatpush.msra.mxu1 %v562_v7  ;;  %v95_v55 = vld [vmem:[#allocation5 + $0x108] sm:$0xff] }
 0x103   :  { %1344 = vmatpush.msra.mxu3 %v130_v6  ;;  %1418 = vmatpush.msrb.mxu2 %v203_v10  ;;  %v563_v56 = vld [vmem:[#allocation5 + $0xfa8] sm:$0xff]  ;;  %v2098_v10 = vpop.f32.mrf.mxu0 }
 0x104   :  { %1363 = vmatpush.msra.mxu0 %v334_v8  ;;  %1381 = vmatpush.msra.mxu1 %v550_v12  ;;  %v347_v57 = vld [vmem:[#allocation5 + $0x8e8] sm:$0xff]  ;;  %v444_v8 = vld [vmem:[#allocation5 + $0xbf0] sm:$0xff] }
 0x105   :  { %1345 = vmatpush.msra.mxu3 %v118_v11  ;;  %1419 = vmatpush.msrb.mxu2 %v191_v14  ;;  %v83_v58 = vld [vmem:[#allocation5 + $0xa8] sm:$0xff]  ;;  %v216_v12 = vld [vmem:[#allocation5 + $0x4d0] sm:$0xff] }
 0x106   :  { %1364 = vmatpush.msra.mxu0 %v322_v13  ;;  %1382 = vmatpush.msra.mxu1 %v538_v16  ;;  %v551_v59 = vld [vmem:[#allocation5 + $0xf48] sm:$0xff]  ;;  %v432_v14 = vld [vmem:[#allocation5 + $0xb90] sm:$0xff] }
 0x107   :  { %1346 = vmatpush.msra.mxu3 %v106_v15  ;;  %1420 = vmatpush.msrb.mxu2 %v179_v19  ;;  %v335_v0 = vld [vmem:[#allocation5 + $0x888] sm:$0xff]  ;;  %v204_v16 = vld [vmem:[#allocation5 + $0x470] sm:$0xff] }
 0x108   :  { %1365 = vmatpush.msra.mxu0 %v310_v17  ;;  %1383 = vmatpush.msra.mxu1 %v526_v21  ;;  %v71_v1 = vld [vmem:[#allocation5 + $0x48] sm:$0xff]  ;;  %v2102_v17 = vpop.f32.mrf.mxu1  ;;  %v2104_v21 = vpop.f32.mrf.mxu3 }
 0x109   :  { %1347 = vmatpush.msra.mxu3 %v94_v20  ;;  %1421 = vmatpush.msrb.mxu2 %v167_v23  ;;  %v539_v4 = vld [vmem:[#allocation5 + $0xee8] sm:$0xff]  ;;  %v420_v20 = vld [vmem:[#allocation5 + $0xb30] sm:$0xff] }
 0x10a   :  { %1366 = vmatpush.msra.mxu0 %v298_v22  ;;  %1384 = vmatpush.msra.mxu1 %v514_v26  ;;  %v323_v6 = vld [vmem:[#allocation5 + $0x828] sm:$0xff]  ;;  %v2106_v22 = vpop.f32.mrf.mxu2 }
 0x10b   :  { %1348 = vmatpush.msra.mxu3 %v82_v25  ;;  %1422 = vmatpush.msrb.mxu2 %v155_v28  ;;  %v527_v7 = vld [vmem:[#allocation5 + $0xe88] sm:$0xff]  ;;  %v192_v25 = vld [vmem:[#allocation5 + $0x410] sm:$0xff] }
 0x10c   :  { %1367 = vmatpush.msra.mxu0 %v286_v27  ;;  %1385 = vmatpush.msra.mxu1 %v502_v30  ;;  %v311_v11 = vld [vmem:[#allocation5 + $0x7c8] sm:$0xff]  ;;  %v408_v27 = vld [vmem:[#allocation5 + $0xad0] sm:$0xff] }
 0x10d   :  { %1349 = vmatpush.msra.mxu3 %v70_v29  ;;  %1423 = vmatpush.msrb.mxu2 %v143_v33  ;;  %v515_v13 = vld [vmem:[#allocation5 + $0xe28] sm:$0xff]  ;;  %v180_v29 = vld [vmem:[#allocation5 + $0x3b0] sm:$0xff] }
 0x10e   :  { %1368 = vmatpush.msra.mxu0 %v274_v2  ;;  %1386 = vmatpush.msra.mxu1 %v490_v32  ;;  %v299_v15 = vld [vmem:[#allocation5 + $0x768] sm:$0xff]  ;;  %v396_v2 = vld [vmem:[#allocation5 + $0xa70] sm:$0xff] }
 0x10f   :  { %1434 = vmatpush.msrb.mxu3 %v443_v31  ;;  %1424 = vmatpush.msrb.mxu2 %v131_v42  ;;  %v503_v19 = vld [vmem:[#allocation5 + $0xdc8] sm:$0xff]  ;;  %v2108_v31 = vpop.f32.mrf.mxu0  ;;  %v168_v33 = vld [vmem:[#allocation5 + $0x350] sm:$0xff] }
 0x110   :  { %1369 = vmatpush.msra.mxu0 %v262_v34  ;;  %1387 = vmatpush.msra.mxu1 %v478_v38  ;;  %v287_v23 = vld [vmem:[#allocation5 + $0x708] sm:$0xff]  ;;  %v156_v38 = vld [vmem:[#allocation5 + $0x2f0] sm:$0xff] }
 0x111   :  { %1435 = vmatpush.msrb.mxu3 %v431_v35  ;;  %1370 = vmatmul.f32.vlgmr.msra.gmra.mxu0 %v2071_v24  ;;  %v491_v26 = vld [vmem:[#allocation5 + $0xd68] sm:$0xff]  ;;  %v636_v35 = vld [vmem:[#allocation5 + $0x11f0] sm:$0xff] }
 0x112   :  { %1454 = vmatpush.msrb.mxu0 %v635_v36  ;;  %1388 = vmatpush.msra.mxu1 %v466_v41  ;;  %v275_v28 = vld [vmem:[#allocation5 + $0x6a8] sm:$0xff]  ;;  %v384_v36 = vld [vmem:[#allocation5 + $0xa10] sm:$0xff]  ;;  %v2114_v42 = vpop.f32.mrf.mxu2 }
 0x113   :  { %1436 = vmatpush.msrb.mxu3 %v419_v39  ;;  %1425 = vmatpush.msrb.mxu2 %v119_v47  ;;  %v479_v30 = vld [vmem:[#allocation5 + $0xd08] sm:$0xff]  ;;  %v2110_v39 = vpop.f32.mrf.mxu1  ;;  %v624_v41 = vld [vmem:[#allocation5 + $0x1190] sm:$0xff] }
 0x114   :  { %1455 = vmatpush.msrb.mxu0 %v623_v40  ;;  %1350 = vmatmul.f32.vlgmr.msra.gmra.mxu3 %v2068_v18  ;;  %v252_v18 = vld [vmem:[#allocation5 + $0x5f0] sm:$0xff]  ;;  %v263_v32 = vld [vmem:[#allocation5 + $0x648] sm:$0xff] }
 0x115   :  { %1437 = vmatpush.msrb.mxu3 %v407_v3  ;;  %1389 = vmatpush.msra.mxu1 %v454_v45  ;;  %v467_v34 = vld [vmem:[#allocation5 + $0xca8] sm:$0xff]  ;;  %v2112_v3 = vpop.f32.mrf.mxu3  ;;  %v612_v45 = vld [vmem:[#allocation5 + $0x1130] sm:$0xff] }
 0x116   :  { %1456 = vmatpush.msrb.mxu0 %v611_v43  ;;  %1426 = vmatpush.msrb.mxu2 %v107_v51  ;;  %v455_v40 = vld [vmem:[#allocation5 + $0xc48] sm:$0xff]  ;;  %v660_v43 = vld [vmem:[#allocation5 + $0x12b0] sm:$0xff] }
 0x117   :  { %1438 = vmatpush.msrb.mxu3 %v395_v44  ;;  %1488 = vmatpush.msrb.mxu1 %v659_v49  ;;  %v372_v44 = vld [vmem:[#allocation5 + $0x9b0] sm:$0xff]  ;;  %v253_v49 = vld [vmem:[#allocation5 + $0x5f8] sm:$0xff] }
 0x118   :  { %1457 = vmatpush.msrb.mxu0 %v599_v9  ;;  %1390 = vmatmul.f32.vlgmr.msra.gmra.mxu1 %v2074_v37  ;;  %v648_v9 = vld [vmem:[#allocation5 + $0x1250] sm:$0xff] }
 0x119   :  { %1439 = vmatpush.msrb.mxu3 %v383_v48  ;;  %1489 = vmatpush.msrb.mxu1 %v647_v52  ;;  %v144_v47 = vld [vmem:[#allocation5 + $0x290] sm:$0xff]  ;;  %v241_v52 = vld [vmem:[#allocation5 + $0x598] sm:$0xff] }
 0x11a   :  { %1458 = vmatpush.msrb.mxu0 %v587_v50  ;;  %1427 = vmatpush.msrb.mxu2 %v95_v55  ;;  %v600_v48 = vld [vmem:[#allocation5 + $0x10d0] sm:$0xff]  ;;  %v2116_v50 = vpop.f32.mrf.mxu0 }
 0x11b   :  { %1440 = vmatpush.msrb.mxu3 %v371_v62  ;;  %1494 = vmatpush.msra.mxu1 %v252_v18  ;;  %v360_v51 = vld [vmem:[#allocation5 + $0x950] sm:$0xff]  ;;  %v2119_v55 = vpop.f32.mrf.mxu1  ;;  %v229_v18 = vld [vmem:[#allocation5 + $0x538] sm:$0xff] }
 0x11c   :  { %1459 = vmatpush.msrb.mxu0 %v575_v53  ;;  %1428 = vmatpush.msrb.mxu2 %v83_v58  ;;  %v588_v62 = vld [vmem:[#allocation5 + $0x1070] sm:$0xff] }
 0x11d   :  { %1441 = vmatpush.msrb.mxu3 %v359_v54  ;;  %1495 = vmatpush.msra.mxu1 %v240_v60  ;;  %v132_v53 = vld [vmem:[#allocation5 + $0x230] sm:$0xff]  ;;  %v2122_v60 = vpop.f32.mrf.mxu3 }
 0x11e   :  { %1460 = vmatpush.msrb.mxu0 %v563_v56  ;;  %1429 = vmatpush.msrb.mxu2 %v71_v1  ;;  %v348_v54 = vld [vmem:[#allocation5 + $0x8f0] sm:$0xff] }
 0x11f   :  { %1442 = vmatpush.msrb.mxu3 %v347_v57  ;;  %1496 = vmatpush.msra.mxu1 %v228_v5  ;;  %v576_v56 = vld [vmem:[#allocation5 + $0x1010] sm:$0xff] }
 0x120   :  { %1461 = vmatpush.msrb.mxu0 %v551_v59  ;;  %1872 = vmatmul.msk.f32.vlgmr.msra.gmra.mxu2 %vm690_vm0, %v2077_v46  ;;  %v120_v57 = vld [vmem:[#allocation5 + $0x1d0] sm:$0xff]  ;;  %v217_v59 = vld [vmem:[#allocation5 + $0x4d8] sm:$0xff] }
 0x121   :  { %1443 = vmatpush.msrb.mxu3 %v335_v0  ;;  %1514 = vmatpush.msra.mxu2 %v444_v8  ;;  %v564_v58 = vld [vmem:[#allocation5 + $0xfb0] sm:$0xff]  ;;  %v2124_v0 = vpop.f32.mrf.mxu2  ;;  %v193_v8 = vld [vmem:[#allocation5 + $0x418] sm:$0xff] }
 0x122   :  { %1462 = vmatpush.msrb.mxu0 %v539_v4  ;;  %1497 = vmatpush.msra.mxu1 %v216_v12  ;;  %v108_v1 = vld [vmem:[#allocation5 + $0x170] sm:$0xff] }
 0x123   :  { %1444 = vmatpush.msrb.mxu3 %v323_v6  ;;  %1515 = vmatpush.msra.mxu2 %v432_v14  ;;  %v324_v4 = vld [vmem:[#allocation5 + $0x830] sm:$0xff]  ;;  %v205_v6 = vld [vmem:[#allocation5 + $0x478] sm:$0xff] }
 0x124   :  { %1463 = vmatpush.msrb.mxu0 %v527_v7  ;;  %1498 = vmatpush.msra.mxu1 %v204_v16  ;;  %v552_v5 = vld [vmem:[#allocation5 + $0xf50] sm:$0xff]  ;;  %v2130_v16 = vld [vmem:[#allocation7] sm:$0xff] }
 0x125   :  { %1445 = vmatpush.msrb.mxu3 %v311_v11  ;;  %1516 = vmatpush.msra.mxu2 %v420_v20  ;;  %v540_v7 = vld [vmem:[#allocation5 + $0xef0] sm:$0xff]  ;;  %v2126_v11 = vpop.f32.mrf.mxu0 }
 0x126   :  { %1464 = vmatpush.msrb.mxu0 %v515_v13  ;;  %1499 = vmatpush.msra.mxu1 %v192_v25  ;;  %v312_v12 = vld [vmem:[#allocation5 + $0x7d0] sm:$0xff]  ;;  %v670_v25 = vperm.slane %v2130_v16, 4 }
 0x127   :  { %1446 = vmatpush.msrb.mxu3 %v299_v15  ;;  %1517 = vmatpush.msra.mxu2 %v408_v27  ;;  %v84_v13 = vld [vmem:[#allocation5 + $0xb0] sm:$0xff]  ;;  %v181_v15 = vld [vmem:[#allocation5 + $0x3b8] sm:$0xff] }
 0x128   :  { %1465 = vmatpush.msrb.mxu0 %v503_v19  ;;  %1500 = vmatpush.msra.mxu1 %v180_v29  ;;  %v528_v14 = vld [vmem:[#allocation5 + $0xe90] sm:$0xff]  ;;  %v169_v27 = vld [vmem:[#allocation5 + $0x358] sm:$0xff] }
 0x129   :  { %1447 = vmatpush.msrb.mxu3 %v287_v23  ;;  %1518 = vmatpush.msra.mxu2 %v396_v2  ;;  %v300_v19 = vld [vmem:[#allocation5 + $0x770] sm:$0xff]  ;;  %v2132_v23 = vpop.f32.mrf.mxu1 }
 0x12a   :  { %1466 = vmatpush.msrb.mxu0 %v491_v26  ;;  %1501 = vmatpush.msra.mxu1 %v168_v33  ;;  %v72_v20 = vld [vmem:[#allocation5 + $0x50] sm:$0xff]  ;;  %v445_v33 = vld [vmem:[#allocation5 + $0xbf8] sm:$0xff] }
 0x12b   :  { %1448 = vmatpush.msrb.mxu3 %v275_v28  ;;  %1519 = vmatpush.msra.mxu2 %v384_v36  ;;  %v516_v26 = vld [vmem:[#allocation5 + $0xe30] sm:$0xff]  ;;  %v1031_v28 = vpop.f32.mrf.mxu3 }
 0x12c   :  { %1467 = vmatpush.msrb.mxu0 %v479_v30  ;;  %1502 = vmatpush.msra.mxu1 %v156_v38  ;;  %v288_v30 = vld [vmem:[#allocation5 + $0x710] sm:$0xff]  ;;  %v145_v38 = vld [vmem:[#allocation5 + $0x298] sm:$0xff] }
 0x12d   :  { %1449 = vmatpush.msrb.mxu3 %v263_v32  ;;  %1520 = vmatpush.msra.mxu2 %v372_v44  ;;  %v504_v2 = vld [vmem:[#allocation5 + $0xdd0] sm:$0xff]  ;;  %v157_v32 = vld [vmem:[#allocation5 + $0x2f8] sm:$0xff] }
 0x12e   :  { %1468 = vmatpush.msrb.mxu0 %v467_v34  ;;  %1503 = vmatpush.msra.mxu1 %v144_v47  ;;  %v2135_v29 = vpop.f32.mrf.mxu2  ;;  %v276_v34 = vld [vmem:[#allocation5 + $0x6b0] sm:$0xff]  ;;  %v133_v44 = vld [vmem:[#allocation5 + $0x238] sm:$0xff] }
 0x12f   :  { %1534 = vmatpush.msra.mxu3 %v636_v35  ;;  %1521 = vmatpush.msra.mxu2 %v360_v51  ;;  %v1032_v35 = vadd.f32 %v1031_v28, %v670_v25  ;;  %v492_v36 = vld [vmem:[#allocation5 + $0xd70] sm:$0xff]  ;;  %v421_v47 = vld [vmem:[#allocation5 + $0xb38] sm:$0xff] }
 0x130   :  { %1469 = vmatpush.msrb.mxu0 %v455_v40  ;;  %1450 = vmatmul.f32.vlgmr.msrb.gmra.mxu3 %v2071_v24  ;;  %v96_v24 = vld [vmem:[#allocation5 + $0x110] sm:$0xff]  ;;  %v1051_v40 = vpop.f32.mrf.mxu0  ;;  %v121_v51 = vld [vmem:[#allocation5 + $0x1d8] sm:$0xff] }
 0x131   :  { %1535 = vmatpush.msra.mxu3 %v624_v41  ;;  %1470 = vmatmul.f32.vlgmr.msrb.gmra.mxu0 %v2074_v37  ;;  %v336_v37 = vld [vmem:[#allocation5 + $0x890] sm:$0xff]  ;;  %v433_v41 = vld [vmem:[#allocation5 + $0xb98] sm:$0xff] }
 0x132   :  { %1568 = vmatpush.msra.mxu0 %v660_v43  ;;  %1504 = vmatpush.msra.mxu1 %v132_v53  ;;  %v480_v43 = vld [vmem:[#allocation5 + $0xd10] sm:$0xff]  ;;  %v637_v53 = vld [vmem:[#allocation5 + $0x11f8] sm:$0xff] }
 0x133   :  { %1536 = vmatpush.msra.mxu3 %v612_v45  ;;  %1522 = vmatpush.msra.mxu2 %v348_v54  ;;  %v671_v45 = vperm.slane %v2130_v16, 5  ;;  %v409_v54 = vld [vmem:[#allocation5 + $0xad8] sm:$0xff] }
 0x134   :  { %1569 = vmatpush.msra.mxu0 %v648_v9  ;;  %1505 = vmatpush.msra.mxu1 %v120_v57  ;;  %v264_v9 = vld [vmem:[#allocation5 + $0x650] sm:$0xff]  ;;  %v109_v57 = vld [vmem:[#allocation5 + $0x178] sm:$0xff] }
 0x135   :  { %1537 = vmatpush.msra.mxu3 %v600_v48  ;;  %1523 = vmatpush.msra.mxu2 %v336_v37  ;;  %v1052_v48 = vadd.f32 %v1051_v40, %v1032_v35  ;;  %v385_v25 = vld [vmem:[#allocation5 + $0xa18] sm:$0xff] }
 0x136   :  { %1574 = vmatpush.msrb.mxu0 %v253_v49  ;;  %1506 = vmatpush.msra.mxu1 %v108_v1  ;;  %v468_v49 = vld [vmem:[#allocation5 + $0xcb0] sm:$0xff]  ;;  %v73_v28 = vld [vmem:[#allocation5 + $0x58] sm:$0xff] }
 0x137   :  { %1538 = vmatpush.msra.mxu3 %v588_v62  ;;  %1524 = vmatpush.msra.mxu2 %v324_v4  ;;  %v1071_v62 = vpop.f32.mrf.mxu1  ;;  %v661_v4 = vld [vmem:[#allocation5 + $0x12b8] sm:$0xff] }
 0x138   :  { %1575 = vmatpush.msrb.mxu0 %v241_v52  ;;  %1507 = vmatpush.msra.mxu1 %v96_v24  ;;  %v1072_v1 = vadd.f32 %v1071_v62, %v1052_v48  ;;  %v361_v35 = vld [vmem:[#allocation5 + $0x958] sm:$0xff] }
 0x139   :  { %1539 = vmatpush.msra.mxu3 %v576_v56  ;;  %1874 = vmatmul.msk.f32.vlgmr.msra.gmra.mxu0 %vm690_vm0, %v2077_v46  ;;  %v667_v56 = vperm.slane %v2130_v16, 1  ;;  %v565_v40 = vld [vmem:[#allocation5 + $0xfb8] sm:$0xff] }
 0x13a   :  { %1576 = vmatpush.msrb.mxu0 %v229_v18  ;;  %1525 = vmatpush.msra.mxu2 %v312_v12  ;;  %v456_v18 = vld [vmem:[#allocation5 + $0xc50] sm:$0xff]  ;;  %v613_v12 = vld [vmem:[#allocation5 + $0x1138] sm:$0xff] }
 0x13b   :  { %1540 = vmatpush.msra.mxu3 %v564_v58  ;;  %1508 = vmatpush.msra.mxu1 %v84_v13  ;;  %v625_v58 = vld [vmem:[#allocation5 + $0x1198] sm:$0xff]  ;;  %v792_v13 = vadd.f32 %v2104_v21, %v667_v56 }
 0x13c   :  { %1577 = vmatpush.msrb.mxu0 %v217_v59  ;;  %1526 = vmatpush.msra.mxu2 %v300_v19  ;;  %v666_v59 = vperm.slane %v2130_v16, 0  ;;  %v85_v19 = vld [vmem:[#allocation5 + $0xb8] sm:$0xff] }
 0x13d   :  { %1541 = vmatpush.msra.mxu3 %v552_v5  ;;  %1509 = vmatpush.msra.mxu1 %v72_v20  ;;  %v97_v5 = vld [vmem:[#allocation5 + $0x118] sm:$0xff] }
 0x13e   :  { %1578 = vmatpush.msrb.mxu0 %v205_v6  ;;  %1873 = vmatmul.msk.f32.vlgmr.msrb.gmra.mxu1 %vm690_vm0, %v2077_v46  ;;  %v2140_v46 = vld [vmem:[#allocation2] sm:$0xff]  ;;  %v373_v21 = vld [vmem:[#allocation5 + $0x9b8] sm:$0xff] }
 0x13f   :  { %1542 = vmatpush.msra.mxu3 %v540_v7  ;;  %1527 = vmatpush.msra.mxu2 %v288_v30  ;;  %v601_v30 = vld [vmem:[#allocation5 + $0x10d8] sm:$0xff] }
 0x140   :  { %1579 = vmatpush.msrb.mxu0 %v193_v8  ;;  %1594 = vmatpush.msrb.mxu1 %v445_v33  ;;  %v397_v8 = vld [vmem:[#allocation5 + $0xa78] sm:$0xff] }
 0x141   :  { %1543 = vmatpush.msra.mxu3 %v528_v14  ;;  %1528 = vmatpush.msra.mxu2 %v276_v34  ;;  %v2146_v14 = vld [vmem:[#allocation2 + $0x10] sm:$0xff]  ;;  %v589_v33 = vld [vmem:[#allocation5 + $0x1078] sm:$0xff] }
 0x142   :  { %1580 = vmatpush.msrb.mxu0 %v181_v15  ;;  %1595 = vmatpush.msrb.mxu1 %v433_v41  ;;  %v649_v15 = vld [vmem:[#allocation5 + $0x1258] sm:$0xff] }
 0x143   :  { %1544 = vmatpush.msra.mxu3 %v516_v26  ;;  %1430 = vmatmul.f32.vlgmr.msrb.gmra.mxu2 %v2140_v46  ;;  %v712_v26 = vadd.f32 %v2098_v10, %v666_v59  ;;  %v337_v41 = vld [vmem:[#allocation5 + $0x898] sm:$0xff] }
 0x144   :  { %1581 = vmatpush.msrb.mxu0 %v169_v27  ;;  %1529 = vmatpush.msra.mxu2 %v264_v9  ;;  %v1092_v27 = vadd.f32 %v2135_v29, %v1072_v1  ;;  %v577_v29 = vld [vmem:[#allocation5 + $0x1018] sm:$0xff] }
 0x145   :  { %1545 = vmatpush.msra.mxu3 %v504_v2  ;;  %1596 = vmatpush.msrb.mxu1 %v421_v47  ;;  %v812_v2 = vadd.f32 %v2108_v31, %v792_v13  ;;  %v732_v10 = vadd.f32 %v2102_v17, %v712_v26  ;;  %v1896_v31 = vld [vmem:[#allocation2 + $0x18] sm:$0xff] }
 0x146   :  { %1582 = vmatpush.msrb.mxu0 %v157_v32  ;;  %1614 = vmatpush.msrb.mxu2 %v637_v53  ;;  %v313_v47 = vld [vmem:[#allocation5 + $0x7d8] sm:$0xff] }
 0x147   :  { %1546 = vmatpush.msra.mxu3 %v492_v36  ;;  %v1111_v52 = vpop.f32.mrf.mxu2  ;;  %1597 = vmatpush.msrb.mxu1 %v409_v54  ;;  %v349_v36 = vld [vmem:[#allocation5 + $0x8f8] sm:$0xff]  ;;  %v752_v17 = vadd.f32 %v2094_v61, %v732_v10  ;;  %v668_v54 = vperm.slane %v2130_v16, 2 }
 0x148   :  { %1583 = vmatpush.msrb.mxu0 %v145_v38  ;;  %v1112_v37 = vadd.f32 %v1111_v52, %v671_v45  ;;  %1615 = vmatpush.msrb.mxu2 %v625_v58  ;;  %v832_v38 = vadd.f32 %v2110_v39, %v812_v2  ;;  %v325_v45 = vld [vmem:[#allocation5 + $0x838] sm:$0xff] }
 0x149   :  { %1547 = vmatpush.msra.mxu3 %v480_v43  ;;  %v1131_v6 = vpop.f32.mrf.mxu3  ;;  %1598 = vmatpush.msrb.mxu1 %v397_v8  ;;  %v553_v43 = vld [vmem:[#allocation5 + $0xf58] sm:$0xff]  ;;  %v772_v48 = vadd.f32 %v2096_v63, %v752_v17  ;;  %v673_v8 = vperm.slane %v2130_v16, 7 }
 0x14a   :  { %1584 = vmatpush.msrb.mxu0 %v133_v44  ;;  %v1132_v24 = vadd.f32 %v1131_v6, %v1112_v37  ;;  %1616 = vmatpush.msrb.mxu2 %v613_v12  ;;  %v1897_v44 = vld [vmem:[#allocation2 + $0x8] sm:$0xff]  ;;  %v852_v9 = vadd.f32 %v2106_v22, %v832_v38  ;;  %v541_v39 = vld [vmem:[#allocation5 + $0xef8] sm:$0xff]  ;;  %v872_v37 = vadd.f32 %v2112_v3, %v668_v54  ;;  %v669_v6 = vperm.slane %v2130_v16, 3 }
 0x14b   :  { %1548 = vmatpush.msra.mxu3 %v468_v49  ;;  %v1151_v7 = vpop.f32.mrf.mxu0  ;;  %1599 = vmatpush.msrb.mxu1 %v385_v25  ;;  %v529_v49 = vld [vmem:[#allocation5 + $0xe98] sm:$0xff] }
 0x14c   :  { %1585 = vmatpush.msrb.mxu0 %v121_v51  ;;  %v1152_v20 = vadd.f32 %v1151_v7, %v1132_v24  ;;  %1617 = vmatpush.msrb.mxu2 %v601_v30  ;;  %v301_v51 = vld [vmem:[#allocation5 + $0x778] sm:$0xff]  ;;  %v952_v3 = vadd.f32 %v2122_v60, %v669_v6  ;;  %v663_v60 = vld [vmem:[#allocation7 + $0x8] sm:$0xf] }
 0x14d   :  { %1549 = vmatpush.msra.mxu3 %v456_v18  ;;  %1600 = vmatpush.msrb.mxu1 %v373_v21  ;;  %v517_v61 = vld [vmem:[#allocation5 + $0xe38] sm:$0xff]  ;;  %v672_v18 = vperm.slane %v2130_v16, 6  ;;  %v674_v2 = vperm.slane %v663_v60, 0 }
 0x14e   :  { %1586 = vmatpush.msrb.mxu0 %v109_v57  ;;  %1550 = vmatmul.f32.vlgmr.msra.gmra.mxu3 %v2146_v14  ;;  %v505_v62 = vld [vmem:[#allocation5 + $0xdd8] sm:$0xff] }
 0x14f   :  { %1648 = vmatpush.msrb.mxu3 %v661_v4  ;;  %v1171_v32 = vpop.f32.mrf.mxu1  ;;  %1618 = vmatpush.msrb.mxu2 %v589_v33  ;;  %v277_v22 = vld [vmem:[#allocation5 + $0x6b8] sm:$0xff] }
 0x150   :  { %1587 = vmatpush.msrb.mxu0 %v97_v5  ;;  %v1172_v34 = vadd.f32 %v1171_v32, %v1152_v20  ;;  %1601 = vmatpush.msrb.mxu1 %v361_v35  ;;  %v493_v52 = vld [vmem:[#allocation5 + $0xd78] sm:$0xff]  ;;  %v892_v5 = vadd.f32 %v2114_v42, %v872_v37 }
 0x151   :  { %1649 = vmatpush.msrb.mxu3 %v649_v15  ;;  %1619 = vmatpush.msrb.mxu2 %v577_v29  ;;  %v265_v53 = vld [vmem:[#allocation5 + $0x658] sm:$0xff] }
 0x152   :  { %1588 = vmatpush.msrb.mxu0 %v85_v19  ;;  %1510 = vmatmul.f32.vlgmr.msra.gmra.mxu1 %v2140_v46  ;;  %v481_v63 = vld [vmem:[#allocation5 + $0xd18] sm:$0xff]  ;;  %v912_v13 = vadd.f32 %v2116_v50, %v892_v5 }
 0x153   :  { %1669 = vmatpush.xpose.msra.mxu3 %v1092_v27  ;;  %1602 = vmatpush.msrb.mxu1 %v349_v36  ;;  %v469_v56 = vld [vmem:[#allocation5 + $0xcb8] sm:$0xff]  ;;  %v675_v36 = vperm.slane %v663_v60, 1 }
 0x154   :  { %1589 = vmatpush.msrb.mxu0 %v73_v28  ;;  %1530 = vmatmul.f32.vlgmr.msra.gmra.mxu2 %v1897_v44  ;;  %v457_v57 = vld [vmem:[#allocation5 + $0xc58] sm:$0xff]  ;;  %v932_v25 = vadd.f32 %v2119_v55, %v912_v13 }
 0x155   :  { %1590 = vmatmul.f32.vlgmr.msrb.gmra.mxu0 %v2140_v46  ;;  %1620 = vmatpush.msrb.mxu2 %v565_v40  ;;  %v289_v46 = vld [vmem:[#allocation5 + $0x718] sm:$0xff] }
 0x156   :  { %1689 = vmatpush.xpose.msra.mxu0 %v1172_v34  ;;  %1875 = vmatmul.msk.f32.vlgmr.msrb.gmra.mxu3 %vm690_vm0, %v1896_v31 }
 0x157   :  { %1603 = vmatpush.msrb.mxu1 %v337_v41  ;;  %1621 = vmatpush.msrb.mxu2 %v553_v43 }
 0x159   :  { %1604 = vmatpush.msrb.mxu1 %v325_v45  ;;  %1622 = vmatpush.msrb.mxu2 %v541_v39 }
 0x15b   :  { %1605 = vmatpush.msrb.mxu1 %v313_v47  ;;  %1623 = vmatpush.msrb.mxu2 %v529_v49 }
 0x15d   :  { %1690 = vmatmul.f32.vlgmr.msra.gmra.mxu0 %v852_v9  ;;  %1606 = vmatpush.msrb.mxu1 %v301_v51 }
 0x15e   :  { %1670 = vmatmul.f32.vlgmr.msra.gmra.mxu3 %v772_v48  ;;  %1624 = vmatpush.msrb.mxu2 %v517_v61 }
 0x15f   :  { %1607 = vmatpush.msrb.mxu1 %v289_v46  ;;  %v677_v46 = vperm.slane %v663_v60, 3 }
 0x160   :  { %1625 = vmatpush.msrb.mxu2 %v505_v62 }
 0x161   :  { %1608 = vmatpush.msrb.mxu1 %v277_v22 }
 0x162   :  { %1626 = vmatpush.msrb.mxu2 %v493_v52 }
 0x163   :  { %1609 = vmatpush.msrb.mxu1 %v265_v53 }
 0x164   :  { %1610 = vmatmul.f32.vlgmr.msrb.gmra.mxu1 %v1897_v44  ;;  %1627 = vmatpush.msrb.mxu2 %v481_v63  ;;  %v676_v44 = vperm.slane %v663_v60, 2 }
 0x166   :  { %v1251_v58 = vpop.f32.mrf.mxu0  ;;  %1628 = vmatpush.msrb.mxu2 %v469_v56 }
 0x168   :  { %1629 = vmatpush.msrb.mxu2 %v457_v57 }
 0x169   :  { %v1191_v59 = vpop.f32.mrf.mxu1  ;;  %1630 = vmatmul.f32.vlgmr.msrb.gmra.mxu2 %v2146_v14  ;;  %v972_v14 = vadd.f32 %v2132_v23, %v952_v3 }
 0x16a   :  { %v1192_v1 = vadd.f32 %v1191_v59, %v672_v18  ;;  %v1211_v4 = vpop.f32.mrf.mxu2 }
 0x16b   :  { %v992_v16 = vadd.f32 %v2124_v0, %v972_v14 }
 0x16c   :  { %v1212_v24 = vadd.f32 %v1211_v4, %v1192_v1  ;;  %v1231_v7 = vpop.f32.mrf.mxu3 }
 0x16d   :  { %v1012_v50 = vadd.f32 %v2126_v11, %v992_v16 }
 0x16e   :  { %v1232_v12 = vadd.f32 %v1231_v7, %v1212_v24 }
 0x170   :  { %v1252_v15 = vadd.f32 %v1251_v58, %v1232_v12  ;;  %v1271_v19 = vpop.f32.mrf.mxu0 }
 0x171   :  { %v1272_v20 = vadd.f32 %v1271_v19, %v673_v8 }
 0x172   :  { %1709 = vmatpush.xpose.msra.mxu1 %v1252_v15  ;;  %v1291_v42 = vpop.f32.mrf.mxu1 }
 0x173   :  { %v1292_v26 = vadd.f32 %v1291_v42, %v1272_v20 }
 0x174   :  { %v1311_v27 = vpop.f32.mrf.mxu2 }
 0x175   :  { %1710 = vmatmul.f32.vlgmr.msra.gmra.mxu1 %v932_v25  ;;  %v1312_v28 = vadd.f32 %v1311_v27, %v1292_v26 }
 0x176   :  { %v1331_v30 = vpop.f32.mrf.mxu3 }
 0x177   :  { %v1332_v21 = vadd.f32 %v1331_v30, %v1312_v28 }
 0x179   :  { %1729 = vmatpush.xpose.msra.mxu2 %v1332_v21 }
 0x17c   :  { %1730 = vmatmul.f32.vlgmr.msra.gmra.mxu2 %v1012_v50 }
 0x18e   :  { %v1371_v55 = vpop.f32.mrf.mxu0 }
 0x195   :  { %v1391_v23 = vpop.f32.mrf.mxu1 }
 0x197   :  { %v1351_v32 = vpop.f32.mrf.mxu3 }
 0x198   :  { %v1352_v33 = vadd.f32 %v1351_v32, %v674_v2 }
 0x19a   :  { %v1372_v34 = vadd.f32 %v1371_v55, %v1352_v33 }
 0x19c   :  { %v1392_v35 = vadd.f32 %v1391_v23, %v1372_v34 }
 0x1a3   :  { %v1411_v10 = vpop.f32.mrf.mxu2 }
 0x1a4   :  { %v1412_v29 = vadd.f32 %v1411_v10, %v1392_v35 }
 0x1a6   :  { %1777 = vmatpush.msrb.mxu3 %v1412_v29 }
 0x1ae   :  { %v1471_v41 = vpop.f32.mrf.mxu0 }
 0x1b3   :  { %v1451_v31 = vpop.f32.mrf.mxu3 }
 0x1b6   :  { %v1571_v48 = vpop.f32.mrf.mxu0 }
 0x1bb   :  { %v1491_v17 = vpop.f32.mrf.mxu1 }
 0x1c6   :  { %v1431_v38 = vpop.f32.mrf.mxu2 }
 0x1c7   :  { %v1432_v0 = vadd.f32 %v1431_v38, %v675_v36 }
 0x1c9   :  { %v1452_v40 = vadd.f32 %v1451_v31, %v1432_v0 }
 0x1cb   :  { %v1472_v11 = vadd.f32 %v1471_v41, %v1452_v40 }
 0x1cd   :  { %v1492_v43 = vadd.f32 %v1491_v17, %v1472_v11 }
 0x1cf   :  { %1797 = vmatpush.msrb.mxu0 %v1492_v43  ;;  %v1511_v45 = vpop.f32.mrf.mxu1 }
 0x1d0   :  { %v1512_v9 = vadd.f32 %v1511_v45, %v676_v44 }
 0x1d1   :  { %v1551_v49 = vpop.f32.mrf.mxu3 }
 0x1d2   :  { %v1591_v62 = vpop.f32.mrf.mxu0 }
 0x1d3   :  { %v1592_v22 = vadd.f32 %v1591_v62, %v677_v46 }
 0x1d7   :  { %v1531_v39 = vpop.f32.mrf.mxu2 }
 0x1d8   :  { %v1532_v47 = vadd.f32 %v1531_v39, %v1512_v9 }
 0x1d9   :  { %v1651_v56 = vpop.f32.mrf.mxu3 }
 0x1da   :  { %v1552_v51 = vadd.f32 %v1551_v49, %v1532_v47  ;;  %v1691_v37 = vpop.f32.mrf.mxu0 }
 0x1dc   :  { %v1572_v61 = vadd.f32 %v1571_v48, %v1552_v51 }
 0x1de   :  { %1817 = vmatpush.msrb.mxu1 %v1572_v61 }
 0x1e1   :  { %v1611_v52 = vpop.f32.mrf.mxu1  ;;  %v1671_v57 = vpop.f32.mrf.mxu3 }
 0x1e2   :  { %v1612_v53 = vadd.f32 %v1611_v52, %v1592_v22  ;;  %v1692_v59 = vadd.f32 %v1691_v37, %v1671_v57 }
 0x1ec   :  { %v1631_v63 = vpop.f32.mrf.mxu2 }
 0x1ed   :  { %v1632_v54 = vadd.f32 %v1631_v63, %v1612_v53 }
 0x1ef   :  { %v1652_v18 = vadd.f32 %v1651_v56, %v1632_v54 }
 0x1f1   :  { %1837 = vmatpush.msrb.mxu2 %v1652_v18 }
 0x1f2   :  { %v1711_v58 = vpop.f32.mrf.mxu1 }
 0x1f3   :  { %v1712_v1 = vadd.f32 %v1711_v58, %v1692_v59 }
 0x1ff   :  { %v1731_v4 = vpop.f32.mrf.mxu2 }
 0x200   :  { %v1732_v5 = vadd.f32 %v1731_v4, %v1712_v1 }
 0x202   :  { %v1735_v6 = vsel %vm1734_vm1, %v1732_v5, -inf }
 0x203   :  { %1736 = vmax.xlane.f32.xlu0 %v1735_v6 }
 0x276   :  { %v1737_v24 = vpop.xlane.xlu0 %1736 }
 0x277   :  { %v1738_v7 = vsub.f32 %v1732_v5, %v1737_v24 }
 0x279   :  { %v1739_v8 = vmul.f32 1.442695, %v1738_v7 }
 0x27b   :  { %1886 = vpow2.f32 %v1739_v8 }
 0x281   :  { %v1887_v12 = vpop.eup %1886 }
 0x282   :  { %v1741_v13 = vsel %vm1734_vm1, %v1887_v12, 0.0 }
 0x283   :  { %1742 = vadd.xlane.f32.xlu0 %v1741_v13 }
 0x2f6   :  { %v1743_v3 = vpop.xlane.xlu0 %1742 }
 0x2f7   :  { %1888 = vrcp.f32 %v1743_v3  ;;  %v1755_v25 = vand.u32 2147483648, %v1743_v3  ;;  %v1753_v42 = vand.u32 2147483647, %v1743_v3  ;;  %vm1749_vm3 = vweird.f32 %v1743_v3 }
 0x2f9   :  { %v1756_v27 = vor.u32 1.1754944e-38, %v1755_v25  ;;  %vm1754_vm5 = vcmp.eq.f32.partialorder %v1753_v42, 8.507059e+37 }
 0x2fd   :  { %v1889_v15 = vpop.eup %1888 }
 0x2fe   :  { %v1745_v19 = vmul.f32 %v1889_v15, %v1743_v3  ;;  %vm1750_vm2 = vweird.f32 %v1889_v15 }
 0x2ff   :  { %vm1751_vm4 = vmor %vm1749_vm3, %vm1750_vm2 }
 0x300   :  { %v1746_v20 = vsub.f32 1.0, %v1745_v19 }
 0x302   :  { %v1747_v14 = vmul.f32 %v1889_v15, %v1746_v20 }
 0x304   :  { %v1748_v26 = vadd.f32 %v1889_v15, %v1747_v14 }
 0x306   :  { %v1752_v28 = vsel %vm1751_vm4, %v1889_v15, %v1748_v26 }
 0x307   :  { %v1757_v16 = vsel %vm1754_vm5, %v1756_v27, %v1752_v28 }
 0x308   :  { %v1758_v30 = vmul.f32 %v1887_v12, %v1757_v16 }
 0x30a   :  { %1876 = vmatmul.msk.f32.vlgmr.msrb.gmra.mxu3 %vm1734_vm1, %v1758_v30  ;;  %1877 = vmatmul.msk.f32.vlgmr.msrb.gmra.mxu0 %vm1734_vm1, %v1758_v30 }
 0x30b   :  { %1878 = vmatmul.msk.f32.vlgmr.msrb.gmra.mxu1 %vm1734_vm1, %v1758_v30  ;;  %1879 = vmatmul.msk.f32.vlgmr.msrb.gmra.mxu2 %vm1734_vm1, %v1758_v30 }
 0x387   :  { %v1799_v21 = vpop.f32.mrf.mxu0 }
 0x388   :  { %1843 = vst [vmem:[#allocation8 + $0x8] sm:$0xff] %v1799_v21  ;;  %v1819_v50 = vpop.f32.mrf.mxu1 }
 0x389   :  { %1844 = vst [vmem:[#allocation8 + $0x10] sm:$0xff] %v1819_v50 }
 0x38d   :  { %v1779_v60 = vpop.f32.mrf.mxu3 }
 0x38e   :  { %1842 = vst [vmem:[#allocation8] sm:$0xff] %v1779_v60  ;;  %v1839_v2 = vpop.f32.mrf.mxu2 }
 0x38f   :  { %1845 = vst [vmem:[#allocation8 + $0x18] sm:$0xff] %v1839_v2 }
 0x390   :  { %1856 = dma.vmem_to_hbm [thread:$0]  %s1852_s2, 512, %s1854_s30, [#allocation4]  }
 0x391   :  { %1998 = dma.done.wait [#allocation4], 512  }
 0x392   :  { %1999 = vsyncadd [#allocation4], 4294966784 }
 0x393   :  { %1861 = vsyncpa [#allocation3], 1 }
 0x394   :  { %1862 = vsyncpa [#allocation6], 1 }
 0x395   :  { %1863 = vsyncpa [#allocation4], 1 }

</bundles_post_ra>
